<compile_context>
chip_gen: v6e
topology: v6e:2x2x1
jax: 0.10.0
libtpu: 0.0.40
codegen_flags: <defaults>
</compile_context>

<pallas_src>
import jax
import jax.numpy as jnp
from jax import lax
from jax.experimental import pallas as pl
from jax.experimental.pallas import tpu as pltpu

FEAT = 512          # feat (default in the module)
POSE_DIM = 63
BETA_DIM = 10
H1, H2 = 64, 128


def _make_pool_kernel(n_chunks: int, chunk_n: int):
    """PointNet trunk + max-pool.  grid = (B, point_split, k_tiles)."""

    def kernel(x_ref, w1_ref, b1_ref, w2_ref, b2_ref, w3_ref, b3_ref, g_ref):
        k = pl.program_id(2)

        @pl.when(k == 0)
        def _():
            # Zero init supplies the layer-3 ReLU clamp (bias/ReLU are folded
            # into the pooled vector below), so this init is load-bearing.
            g_ref[...] = jnp.zeros_like(g_ref)

        def chunk_body(c, m):
            off = pl.multiple_of(c * chunk_n, chunk_n)
            xc = x_ref[0, pl.ds(off, chunk_n), :].astype(jnp.float32)   # (CN, 3)

            # Layer 1: Conv1d(3, 64, 1) + ReLU as 3 broadcast FMAs on the VPU
            # (a K=3 MXU matmul wastes a full MXU pass).
            h = (xc[:, 0:1] * w1_ref[0:1, :]
                 + xc[:, 1:2] * w1_ref[1:2, :]
                 + xc[:, 2:3] * w1_ref[2:3, :]
                 + b1_ref[...])
            h = jnp.maximum(h, 0.0).astype(jnp.bfloat16)                # (CN, 64)

            # Layer 2: Conv1d(64, 128, 1) + ReLU on the MXU (bf16 in, f32 acc).
            h = jnp.dot(h, w2_ref[...],
                        preferred_element_type=jnp.float32) + b2_ref[...]
            h = jnp.maximum(h, 0.0).astype(jnp.bfloat16)                # (CN, 128)

            # Layer 3: Conv1d(128, feat, 1) WITHOUT bias/ReLU — both commute
            # with the row-max, so only the raw MXU output is reduced here
            # (sublane max on the XLU, no f32 VALU epilogue).
            h3 = jnp.dot(h, w3_ref[...],
                         preferred_element_type=jnp.float32)            # (CN, FEAT)
            return jnp.maximum(m, jnp.max(h3, axis=0, keepdims=True))

        m0 = jnp.full((1, FEAT), -jnp.inf, dtype=jnp.float32)
        m = lax.fori_loop(0, n_chunks, chunk_body, m0, unroll=True)

        # Fold layer-3 bias + ReLU into the pooled (1, FEAT) vector:
        #   max_n relu(x_n @ W3 + b3) == max(max_n(x_n @ W3) + b3, 0)
        # where the 0-clamp comes from the zero-initialized g_ref.
        g_ref[0, 0] = jnp.maximum(g_ref[0, 0], m + b3_ref[...])

    return kernel


def pointnet_encoder(x, params, *, tile_n=2048, chunk_n=256, point_split=2):
    """PointNetEncoder.forward:  x (B, N, 3) -> (pose (B, 63), beta (B, 10))."""
    B, N, C = x.shape
    assert C == 3
    (w1, b1, w2, b2, w3, b3, wp, bp, wb, bb) = params

    split = max(1, int(point_split))
    chunk_n = max(8, int(chunk_n))

    # --- point-axis sizing --------------------------------------------------
    # Pad N so each of the `split` partitions holds a whole number of chunk_n
    # chunks, clamp tile_n (a multiple of chunk_n) to the partition length,
    # then pad each partition to a whole number of tiles.
    n_unit = chunk_n * split
    per_split = (pl.cdiv(N, n_unit) * n_unit) // split        # multiple of chunk_n
    tile_n = max(chunk_n, (min(int(tile_n), per_split) // chunk_n) * chunk_n)
    k_tiles = pl.cdiv(per_split, tile_n)
    per_split = k_tiles * tile_n
    n_pad = per_split * split
    n_chunks = tile_n // chunk_n

    # Edge-pad by duplicating the last point (safe: pooling is a max).
    if n_pad != N:
        x = jnp.concatenate(
            [x, jnp.broadcast_to(x[:, -1:, :], (B, n_pad - N, C))], axis=1)

    # bf16 x halves the input DMA bytes / VMEM; MXU weights bf16; biases and
    # all epilogue / pooling math stay f32 (v5e has no bf16 VALU).
    x = x.astype(jnp.bfloat16)
    w2b = w2.astype(jnp.bfloat16)
    w3b = w3.astype(jnp.bfloat16)

    const = lambda a: pl.BlockSpec(a.shape, lambda b, p, k: (0,) * a.ndim)

    grid_spec = pltpu.PrefetchScalarGridSpec(
        num_scalar_prefetch=0,
        grid=(B, split, k_tiles),
        in_specs=[
            pl.BlockSpec((1, tile_n, 3),
                         lambda b, p, k: (b, p * k_tiles + k, 0)),      # x
            const(w1), const(b1),
            const(w2b), const(b2),
            const(w3b), const(b3),
        ],
        # One (1, FEAT) row per (batch, point-partition); the trailing
        # singleton keeps the block's last-two dims equal to the array's.
        out_specs=pl.BlockSpec((1, 1, 1, FEAT), lambda b, p, k: (b, p, 0, 0)),
    )

    g_parts = pl.pallas_call(
        _make_pool_kernel(n_chunks, chunk_n),
        grid_spec=grid_spec,
        out_shape=jax.ShapeDtypeStruct((B, split, 1, FEAT), jnp.float32),
        compiler_params=pltpu.CompilerParams(
            dimension_semantics=("parallel", "parallel", "arbitrary")),
    )(x, w1, b1, w2b, b2, w3b, b3)

    # Combine per-partition maxima (2 partitions keep both v7x TCs busy even
    # at B == 1).  Tiny pose/beta heads (M=B, N=63/10) run in plain XLA —
    # inside the kernel they waste MXU passes and force masked stores.
    g = jnp.max(g_parts[:, :, 0, :], axis=1)                           # (B, FEAT)
    pose = g @ wp + bp
    beta = g @ wb + bb
    return pose, beta


def init_params(key):
    """Deterministic synthetic parameters.

    Conv1d(in, out, 1) weights stored transposed as (in, out) so the kernel
    does x @ W; Linear(in, out) likewise (in, out).  Biases are (1, out).
    """
    ks = jax.random.split(key, 10)

    def mat(k, fan_in, fan_out):
        return (jax.random.normal(k, (fan_in, fan_out), jnp.float32)
                * (1.0 / jnp.sqrt(fan_in)))

    w1 = mat(ks[0], 3, H1);          b1 = mat(ks[1], 1, H1)
    w2 = mat(ks[2], H1, H2);         b2 = mat(ks[3], 1, H2)
    w3 = mat(ks[4], H2, FEAT);       b3 = mat(ks[5], 1, FEAT)
    wp = mat(ks[6], FEAT, POSE_DIM); bp = mat(ks[7], 1, POSE_DIM)
    wb = mat(ks[8], FEAT, BETA_DIM); bb = mat(ks[9], 1, BETA_DIM)
    return (w1, b1, w2, b2, w3, b3, wp, bp, wb, bb)


def reference_f32(x, params):
    """Pure-f32 reference (== the PyTorch module's math)."""
    (w1, b1, w2, b2, w3, b3, wp, bp, wb, bb) = params
    h = jnp.maximum(x @ w1 + b1, 0.0)
    h = jnp.maximum(h @ w2 + b2, 0.0)
    h = jnp.maximum(h @ w3 + b3, 0.0)
    g = jnp.max(h, axis=1)                 # max over points (== torch.max(x, 2))
    return g @ wp + bp, g @ wb + bb


def reference_matched(x, params):
    """Reference using the kernel's exact arithmetic (bf16 MXU dots, folded
    layer-3 bias/ReLU)."""
    (w1, b1, w2, b2, w3, b3, wp, bp, wb, bb) = params
    bf = lambda a: a.astype(jnp.bfloat16)
    xb = bf(x).astype(jnp.float32)
    h = jnp.maximum(xb @ w1 + b1, 0.0)
    h = jnp.maximum(jnp.dot(bf(h), bf(w2),
                            preferred_element_type=jnp.float32) + b2, 0.0)
    h3 = jnp.dot(bf(h), bf(w3), preferred_element_type=jnp.float32)
    g = jnp.maximum(jnp.max(h3, axis=1) + b3, 0.0)
    return g @ wp + bp, g @ wb + bb


if __name__ == "__main__":
    key = jax.random.PRNGKey(0)
    kx, kp = jax.random.split(key)

    B, N = 2, 300                           # small cloud, deliberately ragged
    x = jax.random.normal(kx, (B, N, 3), jnp.float32)
    params = init_params(kp)

    pose, beta = pointnet_encoder(x, params)
    jax.block_until_ready((pose, beta))

    assert pose.shape == (B, POSE_DIM) and beta.shape == (B, BETA_DIM)

    # Tight check vs a reference using the same arithmetic as the kernel.
    p_m, b_m = reference_matched(x, params)
    assert jnp.allclose(pose, p_m, atol=1e-2, rtol=1e-2)
    assert jnp.allclose(beta, b_m, atol=1e-2, rtol=1e-2)

    # Loose check vs the pure-f32 (PyTorch-equivalent) reference.
    p_f, b_f = reference_f32(x, params)
    assert jnp.allclose(pose, p_f, atol=5e-2, rtol=5e-2)
    assert jnp.allclose(beta, b_f, atol=5e-2, rtol=5e-2)

    print("KERNEL_OK")
</pallas_src>

<mosaic_0001>
module attributes {stable_mosaic.version = 11 : i64} {
  func.func @kernel(%arg0: i32, %arg1: i32, %arg2: i32, %arg3: memref<1x256x3xbf16, #tpu.memory_space<vmem>>, %arg4: memref<3x64xf32, #tpu.memory_space<vmem>>, %arg5: memref<1x64xf32, #tpu.memory_space<vmem>>, %arg6: memref<64x128xbf16, #tpu.memory_space<vmem>>, %arg7: memref<1x128xf32, #tpu.memory_space<vmem>>, %arg8: memref<128x512xbf16, #tpu.memory_space<vmem>>, %arg9: memref<1x512xf32, #tpu.memory_space<vmem>>, %arg10: memref<1x1x1x512xf32, #tpu.memory_space<vmem>>) attributes {dimension_semantics = [#tpu.dimension_semantics<parallel>, #tpu.dimension_semantics<parallel>, #tpu.dimension_semantics<arbitrary>], iteration_bounds = array<i64: 2, 2, 1>, scalar_prefetch = 0 : i64, scratch_operands = 0 : i64, tpu.core_type = #tpu.core_type<tc>, window_params = [{transform_indices = @transform_0, window_bounds = array<i64: 1, 256, 3>}, {pipeline_mode = #tpu.pipeline_mode<synchronous>, transform_indices = @transform_1, window_bounds = array<i64: 3, 64>}, {pipeline_mode = #tpu.pipeline_mode<synchronous>, transform_indices = @transform_2, window_bounds = array<i64: 1, 64>}, {pipeline_mode = #tpu.pipeline_mode<synchronous>, transform_indices = @transform_3, window_bounds = array<i64: 64, 128>}, {pipeline_mode = #tpu.pipeline_mode<synchronous>, transform_indices = @transform_4, window_bounds = array<i64: 1, 128>}, {pipeline_mode = #tpu.pipeline_mode<synchronous>, transform_indices = @transform_5, window_bounds = array<i64: 128, 512>}, {pipeline_mode = #tpu.pipeline_mode<synchronous>, transform_indices = @transform_6, window_bounds = array<i64: 1, 512>}, {transform_indices = @transform_7, window_bounds = array<i64: 1, 1, 1, 512>}]} {
    %c0_i32 = arith.constant 0 : i32
    %0 = arith.cmpi eq, %arg2, %c0_i32 : i32
    %1 = arith.extui %0 : i1 to i32
    %c0_i32_0 = arith.constant 0 : i32
    %2 = arith.cmpi ne, %1, %c0_i32_0 : i32
    scf.if %2 {
      %cst_30 = arith.constant 0.000000e+00 : f32
      %54 = vector.broadcast %cst_30 : f32 to vector<1x1x1x512xf32>
      %c0_31 = arith.constant 0 : index
      %c0_32 = arith.constant 0 : index
      %c0_33 = arith.constant 0 : index
      %c0_34 = arith.constant 0 : index
      %55 = vector.load %arg10[%c0_31, %c0_32, %c0_33, %c0_34] : memref<1x1x1x512xf32, #tpu.memory_space<vmem>>, vector<1x1x1x512xf32>
      tpu.vector_store %arg10[%c0_31, %c0_32, %c0_33, %c0_34], %54 {strides = array<i32>} : memref<1x1x1x512xf32, #tpu.memory_space<vmem>>, vector<1x1x1x512xf32>,
    } else {
    }
    %cst = arith.constant 0xFF800000 : f32
    %3 = vector.broadcast %cst : f32 to vector<1x512xf32>
    %c0_i32_1 = arith.constant 0 : i32
    %c256_i32 = arith.constant 256 : i32
    %4 = arith.muli %c0_i32_1, %c256_i32 : i32
    %5 = tpu.assume_multiple %4, 256 : i32
    %c0 = arith.constant 0 : index
    %6 = arith.index_cast %5 : i32 to index
    %c0_2 = arith.constant 0 : index
    %7 = vector.load %arg3[%c0, %6, %c0_2] : memref<1x256x3xbf16, #tpu.memory_space<vmem>>, vector<1x256x3xbf16>
    %8 = vector.shape_cast %7 : vector<1x256x3xbf16> to vector<256x3xbf16>
    %9 = arith.extf %8 : vector<256x3xbf16> to vector<256x3xf32>
    %10 = vector.extract_strided_slice %9 {offsets = [0, 0], sizes = [256, 1], strides = [1, 1]} : vector<256x3xf32> to vector<256x1xf32>
    %c0_3 = arith.constant 0 : index
    %c0_4 = arith.constant 0 : index
    %11 = vector.load %arg4[%c0_3, %c0_4] : memref<3x64xf32, #tpu.memory_space<vmem>>, vector<1x64xf32>
    %12 = vector.broadcast %10 : vector<256x1xf32> to vector<256x64xf32>
    %13 = vector.broadcast %11 : vector<1x64xf32> to vector<256x64xf32>
    %14 = arith.mulf %12, %13 : vector<256x64xf32>
    %15 = vector.extract_strided_slice %9 {offsets = [0, 1], sizes = [256, 1], strides = [1, 1]} : vector<256x3xf32> to vector<256x1xf32>
    %c1 = arith.constant 1 : index
    %c0_5 = arith.constant 0 : index
    %16 = vector.load %arg4[%c1, %c0_5] : memref<3x64xf32, #tpu.memory_space<vmem>>, vector<1x64xf32>
    %17 = vector.broadcast %15 : vector<256x1xf32> to vector<256x64xf32>
    %18 = vector.broadcast %16 : vector<1x64xf32> to vector<256x64xf32>
    %19 = arith.mulf %17, %18 : vector<256x64xf32>
    %20 = arith.addf %14, %19 : vector<256x64xf32>
    %21 = vector.extract_strided_slice %9 {offsets = [0, 2], sizes = [256, 1], strides = [1, 1]} : vector<256x3xf32> to vector<256x1xf32>
    %c2 = arith.constant 2 : index
    %c0_6 = arith.constant 0 : index
    %22 = vector.load %arg4[%c2, %c0_6] : memref<3x64xf32, #tpu.memory_space<vmem>>, vector<1x64xf32>
    %23 = vector.broadcast %21 : vector<256x1xf32> to vector<256x64xf32>
    %24 = vector.broadcast %22 : vector<1x64xf32> to vector<256x64xf32>
    %25 = arith.mulf %23, %24 : vector<256x64xf32>
    %26 = arith.addf %20, %25 : vector<256x64xf32>
    %c0_7 = arith.constant 0 : index
    %c0_8 = arith.constant 0 : index
    %27 = vector.load %arg5[%c0_7, %c0_8] : memref<1x64xf32, #tpu.memory_space<vmem>>, vector<1x64xf32>
    %28 = vector.broadcast %27 : vector<1x64xf32> to vector<256x64xf32>
    %29 = arith.addf %26, %28 : vector<256x64xf32>
    %cst_9 = arith.constant 0.000000e+00 : f32
    %30 = vector.broadcast %cst_9 : f32 to vector<256x64xf32>
    %31 = arith.maximumf %29, %30 : vector<256x64xf32>
    %32 = arith.truncf %31 : vector<256x64xf32> to vector<256x64xbf16>
    %c0_10 = arith.constant 0 : index
    %c0_11 = arith.constant 0 : index
    %33 = vector.load %arg6[%c0_10, %c0_11] : memref<64x128xbf16, #tpu.memory_space<vmem>>, vector<64x128xbf16>
    %cst_12 = arith.constant dense<0.000000e+00> : vector<256x128xf32>
    %34 = tpu.matmul %32, %33, %cst_12 {dimension_numbers = #tpu.dot_dimension_numbers<[1], [0], [0], [1], [0, 0, 1, 1], [], []>} : vector<256x64xbf16>, vector<64x128xbf16>, vector<256x128xf32> -> vector<256x128xf32>
    %c0_13 = arith.constant 0 : index
    %c0_14 = arith.constant 0 : index
    %35 = vector.load %arg7[%c0_13, %c0_14] : memref<1x128xf32, #tpu.memory_space<vmem>>, vector<1x128xf32>
    %36 = vector.broadcast %35 : vector<1x128xf32> to vector<256x128xf32>
    %37 = arith.addf %34, %36 : vector<256x128xf32>
    %cst_15 = arith.constant 0.000000e+00 : f32
    %38 = vector.broadcast %cst_15 : f32 to vector<256x128xf32>
    %39 = arith.maximumf %37, %38 : vector<256x128xf32>
    %40 = arith.truncf %39 : vector<256x128xf32> to vector<256x128xbf16>
    %c0_16 = arith.constant 0 : index
    %c0_17 = arith.constant 0 : index
    %41 = vector.load %arg8[%c0_16, %c0_17] : memref<128x512xbf16, #tpu.memory_space<vmem>>, vector<128x512xbf16>
    %cst_18 = arith.constant dense<0.000000e+00> : vector<256x512xf32>
    %42 = tpu.matmul %40, %41, %cst_18 {dimension_numbers = #tpu.dot_dimension_numbers<[1], [0], [0], [1], [0, 0, 1, 1], [], []>} : vector<256x128xbf16>, vector<128x512xbf16>, vector<256x512xf32> -> vector<256x512xf32>
    %cst_19 = arith.constant dense<0xFF800000> : vector<512xf32>
    %43 = vector.multi_reduction <maximumf>, %42, %cst_19 [0] : vector<256x512xf32> to vector<512xf32>
    %44 = vector.shape_cast %43 : vector<512xf32> to vector<1x512xf32>
    %45 = arith.maximumf %3, %44 : vector<1x512xf32>
    %c1_i32 = arith.constant 1 : i32
    %c0_20 = arith.constant 0 : index
    %c0_21 = arith.constant 0 : index
    %c0_22 = arith.constant 0 : index
    %c0_23 = arith.constant 0 : index
    %46 = vector.load %arg10[%c0_20, %c0_21, %c0_22, %c0_23] : memref<1x1x1x512xf32, #tpu.memory_space<vmem>>, vector<1x1x1x512xf32>
    %47 = vector.shape_cast %46 : vector<1x1x1x512xf32> to vector<1x512xf32>
    %c0_24 = arith.constant 0 : index
    %c0_25 = arith.constant 0 : index
    %48 = vector.load %arg9[%c0_24, %c0_25] : memref<1x512xf32, #tpu.memory_space<vmem>>, vector<1x512xf32>
    %49 = arith.addf %45, %48 : vector<1x512xf32>
    %50 = arith.maximumf %47, %49 : vector<1x512xf32>
    %c0_26 = arith.constant 0 : index
    %c0_27 = arith.constant 0 : index
    %c0_28 = arith.constant 0 : index
    %c0_29 = arith.constant 0 : index
    %51 = vector.load %arg10[%c0_26, %c0_27, %c0_28, %c0_29] : memref<1x1x1x512xf32, #tpu.memory_space<vmem>>, vector<1x1x1x512xf32>
    %52 = vector.shape_cast %51 : vector<1x1x1x512xf32> to vector<1x512xf32>
    %53 = vector.shape_cast %50 : vector<1x512xf32> to vector<1x1x1x512xf32>
    tpu.vector_store %arg10[%c0_26, %c0_27, %c0_28, %c0_29], %53 {strides = array<i32>} : memref<1x1x1x512xf32, #tpu.memory_space<vmem>>, vector<1x1x1x512xf32>,
    return
  }
  func.func @transform_0(%arg0: i32, %arg1: i32, %arg2: i32) -> (i32, i32, i32) {
    %c1_i32 = arith.constant 1 : i32
    %0 = arith.muli %arg1, %c1_i32 : i32
    %1 = arith.addi %0, %arg2 : i32
    %c0_i32 = arith.constant 0 : i32
    %c0_i32_0 = arith.constant 0 : i32
    return %arg0, %1, %c0_i32 : i32, i32, i32
  }
  func.func @transform_1(%arg0: i32, %arg1: i32, %arg2: i32) -> (i32, i32) {
    %c0_i32 = arith.constant 0 : i32
    %c0_i32_0 = arith.constant 0 : i32
    %c0_i32_1 = arith.constant 0 : i32
    return %c0_i32, %c0_i32_0 : i32, i32
  }
  func.func @transform_2(%arg0: i32, %arg1: i32, %arg2: i32) -> (i32, i32) {
    %c0_i32 = arith.constant 0 : i32
    %c0_i32_0 = arith.constant 0 : i32
    %c0_i32_1 = arith.constant 0 : i32
    return %c0_i32, %c0_i32_0 : i32, i32
  }
  func.func @transform_3(%arg0: i32, %arg1: i32, %arg2: i32) -> (i32, i32) {
    %c0_i32 = arith.constant 0 : i32
    %c0_i32_0 = arith.constant 0 : i32
    %c0_i32_1 = arith.constant 0 : i32
    return %c0_i32, %c0_i32_0 : i32, i32
  }
  func.func @transform_4(%arg0: i32, %arg1: i32, %arg2: i32) -> (i32, i32) {
    %c0_i32 = arith.constant 0 : i32
    %c0_i32_0 = arith.constant 0 : i32
    %c0_i32_1 = arith.constant 0 : i32
    return %c0_i32, %c0_i32_0 : i32, i32
  }
  func.func @transform_5(%arg0: i32, %arg1: i32, %arg2: i32) -> (i32, i32) {
    %c0_i32 = arith.constant 0 : i32
    %c0_i32_0 = arith.constant 0 : i32
    %c0_i32_1 = arith.constant 0 : i32
    return %c0_i32, %c0_i32_0 : i32, i32
  }
  func.func @transform_6(%arg0: i32, %arg1: i32, %arg2: i32) -> (i32, i32) {
    %c0_i32 = arith.constant 0 : i32
    %c0_i32_0 = arith.constant 0 : i32
    %c0_i32_1 = arith.constant 0 : i32
    return %c0_i32, %c0_i32_0 : i32, i32
  }
  func.func @transform_7(%arg0: i32, %arg1: i32, %arg2: i32) -> (i32, i32, i32, i32) {
    %c0_i32 = arith.constant 0 : i32
    %c0_i32_0 = arith.constant 0 : i32
    %c0_i32_1 = arith.constant 0 : i32
    return %arg0, %arg1, %c0_i32, %c0_i32_0 : i32, i32, i32, i32
  }
}

</mosaic_0001>

<bundles_post_ra>
// kernel: tpu_custom_call.1
= control target key start
LH: loop header
LB: loop body
LE: loop exit
PB: predicated region body
PF: predicated region fallthrough
CT: control target
= control target key end

     0   :  { %s3858_s0 = inlined_call_operand.vmem [shape: bf16[2,512,3], index: 0, kind: input, shape index: {}]   ;;  %s3859_s1 = inlined_call_operand.vmem [shape: f32[3,64], index: 1, kind: input, shape index: {}]   ;;  %s3860_s2 = inlined_call_operand.vmem [shape: f32[1,64], index: 2, kind: input, shape index: {}]   ;;  %s3861_s3 = inlined_call_operand.vmem [shape: bf16[64,128], index: 3, kind: input, shape index: {}]   ;;  %s3862_s4 = inlined_call_operand.vmem [shape: f32[1,128], index: 4, kind: input, shape index: {}]   ;;  %s3863_s5 = inlined_call_operand.vmem [shape: bf16[128,512], index: 5, kind: input, shape index: {}]   ;;  %s3864_s6 = inlined_call_operand.vmem [shape: f32[1,512], index: 6, kind: input, shape index: {}]   ;;  %s3865_s7 = inlined_call_operand.hbm [shape: f32[2,2,1,512], index: 7, kind: output, shape index: {}]  }
   0x1   :  { %3868 = sst [smem:[#allocation26_spill]] %s3858_s0 }
   0x2   :  { %12 = vsyncpa [#allocation3], 0 }
   0x3   :  { %14 = vsyncpa [#allocation3 + $0x1], 0  ;;  %s3025_s24 = smov 0   ;;  %s3027_s25 = smov 0  }
   0x4   :  { %s3029_s26 = smov 0   ;;  %s3031_s27 = smov 0  }
   0x5   :  { %s3033_s28 = smov 0   ;;  %s3035_s29 = smov 0  }
   0x6   :  { %s3037_s30 = smov 0   ;;  %s3039_s8 = smov 0  }
   0x7 LB: > { %s2257_s9 = sadd.s32 4294967295, %s2977_s8   ;;  %s2258_s10 = sadd.s32 4294967294, %s2977_s8   ;;  %s2977_s8 = sphi %s3039_s8, %s20_s8   ;;  %s2973_s30 = sphi %s3037_s30, %s3923_s30   ;;  %s2969_s29 = sphi %s3035_s29, %s3922_s29   ;;  %s2965_s28 = sphi %s3033_s28, %s3921_s28   ;;  %s2961_s27 = sphi %s3031_s27, %s3920_s27   ;;  %s2957_s26 = sphi %s3029_s26, %s3919_s26   ;;  %s2953_s25 = sphi %s3027_s25, %s3918_s25   ;;  %s2949_s24 = sphi %s3025_s24, %s3917_s24  }
   0x8   : > { %s35_s11 = sadd.s32 1, %s2969_s29  ;;  %s39_s12 = sadd.s32 1, %s2973_s30 }
   0x9   : > { %p37_p0 = scmp.ge.s32.totalorder %s35_s11, 2  ;;  %p214_p1 = scmp.ne.s32.totalorder %s2957_s26, %s2953_s25 }
   0xa   : > { %p215_p2 = scmp.eq.s32.totalorder %s2257_s9, 3  ;;  %p220_p5 = scmp.ne.s32.totalorder %s2953_s25, %s2949_s24 }
   0xb   : > { %s3925_s11 = smov (%p37_p0, %s35_s11), 0  ;;  %s3927_s12 = smov (!%p37_p0, %s39_s12), %s2973_s30 }
   0xc   : > { %s200_s13 = ssub.s32 %s2969_s29, %s3925_s11  ;;  %p3076_p3 = por %p215_p2, %p214_p1 }
   0xd   : > { %p41_p4 = scmp.ge.s32.totalorder %s3927_s12, 2  ;;  %p221_p6 = scmp.eq.s32.totalorder %s2258_s10, 3 }
   0xe   : > { %p2261_p7 = scmp.ge.s32.totalorder %s2977_s8, 1  ;;  %p272_p9 = scmp.lt.s32.totalorder %s2977_s8, 5 }
   0xf   : > { %s3929_s12 = smov (%p41_p4, %s3927_s12), 0  ;;  %p3085_p8 = por %p221_p6, %p220_p5 }
  0x10   : > { %s199_s16 = ssub.s32 %s2973_s30, %s3929_s12  ;;  %s204_s17 = sadd.s32 1, %s2957_s26 }
  0x11   : > { %s201_s18 = sor.u32 %s200_s13, %s199_s16  ;;  %p273_p10 = pnand %p2261_p7, %p272_p9 }
  0x12   : > { %p202_p11 = scmp.eq.s32.totalorder %s201_s18, 0 }
  0x13   : > { %276 = sbr.rel (%p273_p10) target bundleno = 768 (0x300), region = 48 }
  0x14   : > { %s3094_s19 = scalar_select %p202_p11, %s2957_s26, %s204_s17  }
  0x18   : > { %s2263_s20 = sshll.u32 %s2961_s27, 5  ;;  %p311_p12 = scmp.lt.s32.totalorder %s2965_s28, 1  ;;  %v2979_v0 = vmov 0   ;;  %v2833_v9 = vld [vmem:[%s3861_s3 + $0x18] sm:$0xff]   ;;  %v2980_v12 = vmov 1   ;;  %v2834_v13 = vld [vmem:[%s3861_s3 + $0x10] sm:$0xff]  }
  0x19   : > { %2564 = vset.pattern.permute.xlu1 %v2979_v0  ;;  %2552 = vset.pattern.permute.xlu0 %v2979_v0  ;;  %p313_p13 = scmp.lt.s32.totalorder %s2263_s20, 63  ;;  %s3871_s0 = sld [smem:[#allocation26_spill]]  ;;  %v2981_v18 = vmov 2   ;;  %v2835_v19 = vld [vmem:[%s3861_s3 + $0x8] sm:$0xff]   ;;  %v2836_v23 = vld [vmem:[%s3861_s3] sm:$0xff]   ;;  %vm1112_vm0 = vcmask 523264  }
  0x1a   : > { %s312_s21 = scalar_select %p311_p12, %s2965_s28, 1  ;;  %2428 = vmatprep.subr.bf16.mxu0 %v2833_v9  ;;  %2468 = vmatprep.subr.bf16.mxu1 %v2833_v9 }
  0x1b   : > { %s3931_s20 = smov (!%p313_p13, %s2263_s20), 63  ;;  %2429 = vmatpush3.bf16.msra.mxu0 %v2833_v9  ;;  %2472 = vmatpush3.bf16.msra.mxu1 %v2833_v9  ;;  %s2324_s10 = sshll.u32 %s2961_s27, 2 }
  0x1c   : > { %s2264_s22 = sshll.u32 %s312_s21, 6  ;;  %2430 = vmatprep.subr.bf16.mxu0 %v2834_v13  ;;  %2469 = vmatprep.subr.bf16.mxu1 %v2834_v13  ;;  %s2325_s13 = sshll.u32 %s2965_s28, 3 }
  0x1d   : > { %s316_s23 = sadd.s32 %s2264_s22, %s3931_s20  ;;  %s306_s20 = sand.u32 1, %s2953_s25  }
  0x1e   : > { %s2265_s9 = sshll.u32 %s316_s23, 2  ;;  %s2262_s21 = sshll.u32 %s306_s20, 2 }
  0x1f   : > { %s3104_s16 = scalar_lea.vmem %s3871_s0, %s2265_s9  ;;  %2431 = vmatpush3.bf16.msra.mxu0 %v2834_v13  ;;  %2473 = vmatpush3.bf16.msra.mxu1 %v2834_v13  ;;  %v3177_v13 = vld [vmem:[%s3859_s1] ss:$0 sm:$0xff]  ;;  %s3579_s22 = scalar_lea.vmem [#allocation2], %s2262_s21 }
  0x20   : > { %v2393_v1 = vld [vmem:[%s3104_s16 + $0x8] sm:$0xff]   ;;  %v2330_v2 = vld [vmem:[%s3104_s16] sm:$0xff]   ;;  %v2394_v10 = vld [vmem:[%s3104_s16 + $0x10] sm:$0xff]   ;;  %2432 = vmatprep.subr.bf16.mxu0 %v2835_v19  ;;  %2470 = vmatprep.subr.bf16.mxu1 %v2835_v19  ;;  %s2171_s17 = sadd.s32 %s2325_s13, %s2324_s10  ;;  %s2175_s18 = sshll.u32 %s3579_s22, 4  ;;  %s2176_s18 = int_to_ptr.vmem [resolvable:$true] %s2175_s18 }
  0x21   : > { %v2335_v3 = vunpack.c.l.bf16 %v2393_v1  ;;  %v2336_v4 = vunpack.c.h.bf16 %v2393_v1  ;;  %v2331_v5 = vunpack.c.l.bf16 %v2330_v2  ;;  %v2332_v6 = vunpack.c.h.bf16 %v2330_v2  ;;  %v2395_v11 = vld [vmem:[%s3104_s16 + $0x18] sm:$0xff]   ;;  %v2397_v24 = vld [vmem:[%s3104_s16 + $0x28] sm:$0xff]   ;;  %v2396_v31 = vld [vmem:[%s3104_s16 + $0x20] sm:$0xff]   ;;  %s2159_s27 = scalar_lea.sflag [#allocation3], %s306_s20  ;;  %s2885_s28 = scalar_lea.vmem %s2176_s18, 64 }
  0x22   : > { %v2339_v14 = vunpack.c.l.bf16 %v2394_v10  ;;  %v2340_v15 = vunpack.c.h.bf16 %v2394_v10  ;;  %v2343_v16 = vunpack.c.l.bf16 %v2395_v11  ;;  %v2344_v17 = vunpack.c.h.bf16 %v2395_v11  ;;  %v2407_v22 = vld [vmem:[%s3104_s16 + $0x78] sm:$0xff]   ;;  %v2401_v39 = vld [vmem:[%s3104_s16 + $0x48] sm:$0xff]   ;;  %v2398_v43 = vld [vmem:[%s3104_s16 + $0x30] sm:$0xff]   ;;  %p2886_p0 = scmp.ne.s32.totalorder %s2176_s18, %s2885_s28  ;;  %s2984_s10 = smov [#allocation2]  }
  0x23   : > { %v2565_v7 = vpack.i.bf16 %v2336_v4, %v2335_v3  ;;  %v2553_v8 = vpack.i.bf16 %v2332_v6, %v2331_v5  ;;  %v2391_v25 = vunpack.c.l.bf16 %v2407_v22  ;;  %v2392_v26 = vunpack.c.h.bf16 %v2407_v22  ;;  %2433 = vmatpush3.bf16.msra.mxu0 %v2835_v19  ;;  %2474 = vmatpush3.bf16.msra.mxu1 %v2835_v19  ;;  %v2399_v32 = vld [vmem:[%s3104_s16 + $0x38] sm:$0xff]   ;;  %v2405_v51 = vld [vmem:[%s3104_s16 + $0x68] sm:$0xff]   ;;  %v2400_v54 = vld [vmem:[%s3104_s16 + $0x40] sm:$0xff]   ;;  %s2889_s13 = sshll.u32 %s2984_s10, 4  ;;  %s2890_s13 = int_to_ptr.vmem [resolvable:$false] %s2889_s13 }
  0x24   : > { %v2589_v20 = vpack.i.bf16 %v2340_v15, %v2339_v14  ;;  %v2601_v21 = vpack.i.bf16 %v2344_v17, %v2343_v16  ;;  %v2351_v28 = vunpack.c.l.bf16 %v2397_v24  ;;  %v2352_v29 = vunpack.c.h.bf16 %v2397_v24  ;;  %2434 = vmatprep.subr.bf16.mxu0 %v2836_v23  ;;  %2471 = vmatprep.subr.bf16.mxu1 %v2836_v23  ;;  %v2403_v44 = vld [vmem:[%s3104_s16 + $0x58] sm:$0xff]   ;;  %v2402_v59 = vld [vmem:[%s3104_s16 + $0x50] sm:$0xff]   ;;  %v2404_v63 = vld [vmem:[%s3104_s16 + $0x60] sm:$0xff]   ;;  %p2887_p1 = pnand %p2886_p0, %p3076_p3  ;;  %p2892_p4 = scmp.lt.s32.totalorder %s2176_s18, %s2890_s13 }
  0x25   : > { %2566 = vperm.xlu1 %2564, %v2565_v7   ;;  %2554 = vperm.xlu0 %2552, %v2553_v8   ;;  %v3130_v27 = vpack.i.bf16 %v2392_v26, %v2391_v25  ;;  %v2347_v33 = vunpack.c.l.bf16 %v2396_v31  ;;  %v2348_v34 = vunpack.c.h.bf16 %v2396_v31  ;;  %v2359_v35 = vunpack.c.l.bf16 %v2399_v32  ;;  %v2406_v4 = vld [vmem:[%s3104_s16 + $0x70] sm:$0xff]   ;;  %v3184_v19 = vld [vmem:[%s3859_s1 + $0x1] ss:$0 sm:$0xff]  ;;  %s2326_s16 = sshll.u32 %s2171_s17, 4  ;;  %s2891_s17 = scalar_lea.vmem %s2890_s13, 128 }
  0x26   : > { %v2636_v30 = vpack.i.bf16 %v2352_v29, %v2351_v28  ;;  %v2360_v36 = vunpack.c.h.bf16 %v2399_v32  ;;  %v2367_v40 = vunpack.c.l.bf16 %v2401_v39  ;;  %v2368_v41 = vunpack.c.h.bf16 %v2401_v39  ;;  %s2173_s9 = scalar_lea.hbm %s3865_s7, %s2326_s16  ;;  %p2888_p2 = pneg %p2887_p1 }
  0x27   : > { %2435 = vmatpush3.bf16.msra.mxu0 %v2836_v23  ;;  %2475 = vmatpush3.bf16.msra.mxu1 %v2836_v23  ;;  %v2624_v37 = vpack.i.bf16 %v2348_v34, %v2347_v33  ;;  %v2355_v45 = vunpack.c.l.bf16 %v2398_v43  ;;  %v2356_v46 = vunpack.c.h.bf16 %v2398_v43  ;;  %v2375_v47 = vunpack.c.l.bf16 %v2403_v44  ;;  %p2893_p5 = scmp.lt.s32.totalorder %s2891_s17, %s2885_s28 }
  0x28   : > { %v2671_v38 = vpack.i.bf16 %v2360_v36, %v2359_v35  ;;  %v2706_v42 = vpack.i.bf16 %v2368_v41, %v2367_v40  ;;  %v2376_v48 = vunpack.c.h.bf16 %v2403_v44  ;;  %v2383_v52 = vunpack.c.l.bf16 %v2405_v51  ;;  %v3197_v35 = vld [vmem:[%s3859_s1 + $0x2] ss:$0 sm:$0xff] }
  0x29   : > { %2570 = vset.pattern.permute.xlu1 %v2980_v12  ;;  %2558 = vset.pattern.permute.xlu0 %v2980_v12  ;;  %v2659_v49 = vpack.i.bf16 %v2356_v46, %v2355_v45  ;;  %v2384_v53 = vunpack.c.h.bf16 %v2405_v51  ;;  %v2363_v56 = vunpack.c.l.bf16 %v2400_v54  ;;  %v2364_v57 = vunpack.c.h.bf16 %v2400_v54  ;;  %p2894_p6 = por %p2893_p5, %p2892_p4 }
  0x2a   : > { %2572 = vperm.xlu1 %2570, %v2565_v7   ;;  %2560 = vperm.xlu0 %2558, %v2553_v8   ;;  %v2741_v50 = vpack.i.bf16 %v2376_v48, %v2375_v47  ;;  %v2371_v60 = vunpack.c.l.bf16 %v2402_v59  ;;  %v2372_v61 = vunpack.c.h.bf16 %v2402_v59  ;;  %v2379_v1 = vunpack.c.l.bf16 %v2404_v63  ;;  %v3206_v47 = vld [vmem:[%s3860_s2] ss:$0 sm:$0xff] }
  0x2b   : > { %v2776_v55 = vpack.i.bf16 %v2384_v53, %v2383_v52  ;;  %v2694_v58 = vpack.i.bf16 %v2364_v57, %v2363_v56  ;;  %v2380_v2 = vunpack.c.h.bf16 %v2404_v63  ;;  %v2387_v5 = vunpack.c.l.bf16 %v2406_v4  ;;  %p2895_p7 = pnand %p2894_p6, %p2888_p2 }
  0x2c   : > { %v2729_v62 = vpack.i.bf16 %v2372_v61, %v2371_v60  ;;  %v2388_v6 = vunpack.c.h.bf16 %v2406_v4 }
  0x2d   : > { %v2764_v3 = vpack.i.bf16 %v2380_v2, %v2379_v1 }
  0x2e   : > { %2576 = vset.pattern.permute.xlu1 %v2981_v18  ;;  %2582 = vset.pattern.permute.xlu0 %v2981_v18  ;;  %v2799_v11 = vpack.i.bf16 %v2388_v6, %v2387_v5 }
  0x2f   : > { %2578 = vperm.xlu1 %2576, %v2553_v8   ;;  %2584 = vperm.xlu0 %2582, %v2565_v7  }
  0x33   : > { %2588 = vset.pattern.permute.xlu1 %v2979_v0  ;;  %2600 = vset.pattern.permute.xlu0 %v2979_v0 }
  0x34   : > { %2590 = vperm.xlu1 %2588, %v2589_v20   ;;  %2602 = vperm.xlu0 %2600, %v2601_v21  }
  0x38   : > { %2594 = vset.pattern.permute.xlu1 %v2980_v12  ;;  %2617 = vset.pattern.permute.xlu0 %v2981_v18 }
  0x39   : > { %2596 = vperm.xlu1 %2594, %v2589_v20   ;;  %2619 = vperm.xlu0 %2617, %v2601_v21  }
  0x3d   : > { %2607 = vperm.xlu1 %2594, %v2601_v21   ;;  %2635 = vset.pattern.permute.xlu0 %v2979_v0 }
  0x3e   : > { %2637 = vperm.xlu0 %2635, %v2636_v30  }
  0x41   : > { %2611 = vset.pattern.permute.xlu1 %v2981_v18 }
  0x42   : > { %2613 = vperm.xlu1 %2611, %v2589_v20   ;;  %2652 = vset.pattern.permute.xlu0 %v2981_v18 }
  0x43   : > { %2654 = vperm.xlu0 %2652, %v2636_v30  }
  0x46   : > { %2623 = vset.pattern.permute.xlu1 %v2979_v0 }
  0x47   : > { %2625 = vperm.xlu1 %2623, %v2624_v37   ;;  %2670 = vset.pattern.permute.xlu0 %v2979_v0 }
  0x48   : > { %2672 = vperm.xlu0 %2670, %v2671_v38  }
  0x4b   : > { %2629 = vset.pattern.permute.xlu1 %v2980_v12 }
  0x4c   : > { %2631 = vperm.xlu1 %2629, %v2624_v37   ;;  %2687 = vset.pattern.permute.xlu0 %v2981_v18 }
  0x4d   : > { %2689 = vperm.xlu0 %2687, %v2671_v38  }
  0x50   : > { %2642 = vperm.xlu1 %2629, %v2636_v30  }
  0x51   : > { %2705 = vset.pattern.permute.xlu0 %v2979_v0 }
  0x52   : > { %2707 = vperm.xlu0 %2705, %v2706_v42  }
  0x54   : > { %2646 = vset.pattern.permute.xlu1 %v2981_v18 }
  0x55   : > { %2648 = vperm.xlu1 %2646, %v2624_v37  }
  0x56   : > { %2722 = vset.pattern.permute.xlu0 %v2981_v18 }
  0x57   : > { %2724 = vperm.xlu0 %2722, %v2706_v42  }
  0x59   : > { %2658 = vset.pattern.permute.xlu1 %v2979_v0 }
  0x5a   : > { %2660 = vperm.xlu1 %2658, %v2659_v49  }
  0x5b   : > { %2740 = vset.pattern.permute.xlu0 %v2979_v0 }
  0x5c   : > { %2742 = vperm.xlu0 %2740, %v2741_v50  }
  0x5e   : > { %2664 = vset.pattern.permute.xlu1 %v2980_v12 }
  0x5f   : > { %2666 = vperm.xlu1 %2664, %v2659_v49  }
  0x60   : > { %2757 = vset.pattern.permute.xlu0 %v2981_v18 }
  0x61   : > { %2759 = vperm.xlu0 %2757, %v2741_v50  }
  0x63   : > { %2677 = vperm.xlu1 %2664, %v2671_v38  }
  0x65   : > { %2775 = vset.pattern.permute.xlu0 %v2979_v0 }
  0x66   : > { %2777 = vperm.xlu0 %2775, %v2776_v55  }
  0x67   : > { %2681 = vset.pattern.permute.xlu1 %v2981_v18 }
  0x68   : > { %2683 = vperm.xlu1 %2681, %v2659_v49  }
  0x6a   : > { %2792 = vset.pattern.permute.xlu0 %v2981_v18 }
  0x6b   : > { %2794 = vperm.xlu0 %2792, %v2776_v55  }
  0x6c   : > { %2693 = vset.pattern.permute.xlu1 %v2979_v0 }
  0x6d   : > { %2695 = vperm.xlu1 %2693, %v2694_v58  }
  0x6f   : > { %2810 = vset.pattern.permute.xlu0 %v2979_v0 }
  0x70   : > { %2812 = vperm.xlu0 %2810, %v3130_v27  }
  0x71   : > { %2699 = vset.pattern.permute.xlu1 %v2980_v12 }
  0x72   : > { %2701 = vperm.xlu1 %2699, %v2694_v58  }
  0x74   : > { %2827 = vset.pattern.permute.xlu0 %v2981_v18 }
  0x75   : > { %2829 = vperm.xlu0 %2827, %v3130_v27  }
  0x76   : > { %2712 = vperm.xlu1 %2699, %v2706_v42  }
  0x7a   : > { %2716 = vset.pattern.permute.xlu1 %v2981_v18 }
  0x7b   : > { %2718 = vperm.xlu1 %2716, %v2694_v58  }
  0x7f   : > { %2728 = vset.pattern.permute.xlu1 %v2979_v0 }
  0x80   : > { %2730 = vperm.xlu1 %2728, %v2729_v62  }
  0x84   : > { %2734 = vset.pattern.permute.xlu1 %v2980_v12 }
  0x85   : > { %2736 = vperm.xlu1 %2734, %v2729_v62  }
  0x89   : > { %2747 = vperm.xlu1 %2734, %v2741_v50  }
  0x8d   : > { %2751 = vset.pattern.permute.xlu1 %v2981_v18 }
  0x8e   : > { %2753 = vperm.xlu1 %2751, %v2729_v62  }
  0x92   : > { %2763 = vset.pattern.permute.xlu1 %v2979_v0 }
  0x93   : > { %2765 = vperm.xlu1 %2763, %v2764_v3  }
  0x97   : > { %2769 = vset.pattern.permute.xlu1 %v2980_v12 }
  0x98   : > { %2771 = vperm.xlu1 %2769, %v2764_v3  }
  0x9c   : > { %2782 = vperm.xlu1 %2769, %v2776_v55  }
  0xa0   : > { %v2567_v7 = vpop.permute.xlu1 %2566  ;;  %2786 = vset.pattern.permute.xlu1 %v2981_v18  ;;  %v2555_v8 = vpop.permute.xlu0 %2554 }
  0xa1   : > { %2788 = vperm.xlu1 %2786, %v2764_v3   ;;  %v2557_v9 = vunpack.i.h.bf16 %v2555_v8  ;;  %v2556_v10 = vunpack.i.l.bf16 %v2555_v8  ;;  %v2569_v14 = vunpack.i.h.bf16 %v2567_v7  ;;  %v2568_v15 = vunpack.i.l.bf16 %v2567_v7 }
  0xa3   : > { %v561_v16 = vmul.f32 %v2557_v9, %v3177_v13  ;;  %v560_v17 = vmul.f32 %v2556_v10, %v3177_v13  ;;  %v563_v31 = vmul.f32 %v2569_v14, %v3177_v13  ;;  %v562_v32 = vmul.f32 %v2568_v15, %v3177_v13 }
  0xa5   : > { %v2573_v20 = vpop.permute.xlu1 %2572  ;;  %2798 = vset.pattern.permute.xlu1 %v2979_v0  ;;  %v2561_v21 = vpop.permute.xlu0 %2560 }
  0xa6   : > { %v2575_v22 = vunpack.i.h.bf16 %v2573_v20  ;;  %v2574_v23 = vunpack.i.l.bf16 %v2573_v20  ;;  %2800 = vperm.xlu1 %2798, %v2799_v11   ;;  %v2563_v24 = vunpack.i.h.bf16 %v2561_v21  ;;  %v2562_v25 = vunpack.i.l.bf16 %v2561_v21 }
  0xa8   : > { %v728_v26 = vmul.f32 %v2575_v22, %v3184_v19  ;;  %v727_v28 = vmul.f32 %v2574_v23, %v3184_v19  ;;  %v726_v29 = vmul.f32 %v2563_v24, %v3184_v19  ;;  %v725_v30 = vmul.f32 %v2562_v25, %v3184_v19 }
  0xaa   : > { %v757_v33 = vadd.f32 %v725_v30, %v560_v17  ;;  %v758_v34 = vadd.f32 %v726_v29, %v561_v16  ;;  %2804 = vset.pattern.permute.xlu1 %v2980_v12  ;;  %v2579_v36 = vpop.permute.xlu1 %2578  ;;  %v2585_v37 = vpop.permute.xlu0 %2584  ;;  %v759_v42 = vadd.f32 %v727_v28, %v562_v32  ;;  %v760_v43 = vadd.f32 %v728_v26, %v563_v31  ;;  %v2839_v28 = vld [vmem:[%s3863_s5 + $0xe4] ss:$16 sps:$4 sm:$0xff]   ;;  %v2840_v29 = vld [vmem:[%s3863_s5 + $0xe8] ss:$16 sps:$4 sm:$0xff]  }
  0xab   : > { %v2581_v38 = vunpack.i.h.bf16 %v2579_v36  ;;  %v2580_v39 = vunpack.i.l.bf16 %v2579_v36  ;;  %v2587_v40 = vunpack.i.h.bf16 %v2585_v37  ;;  %v2586_v41 = vunpack.i.l.bf16 %v2585_v37  ;;  %2806 = vperm.xlu1 %2804, %v2799_v11   ;;  %1562 = vmatprep.subr.bf16.mxu1 %v2839_v28 }
  0xad   : > { %v923_v44 = vmul.f32 %v2581_v38, %v3197_v35  ;;  %v922_v45 = vmul.f32 %v2580_v39, %v3197_v35  ;;  %v925_v12 = vmul.f32 %v2587_v40, %v3197_v35  ;;  %v924_v46 = vmul.f32 %v2586_v41, %v3197_v35  ;;  %v2848_v38 = vld [vmem:[%s3863_s5 + $0xcc] ss:$16 sps:$4 sm:$0xff]  }
  0xaf   : > { %v954_v48 = vadd.f32 %v922_v45, %v757_v33  ;;  %v955_v49 = vadd.f32 %v923_v44, %v758_v34  ;;  %v957_v50 = vadd.f32 %v925_v12, %v760_v43  ;;  %v956_v51 = vadd.f32 %v924_v46, %v759_v42  ;;  %2817 = vperm.xlu1 %2804, %v3130_v27   ;;  %v2591_v52 = vpop.permute.xlu1 %2590  ;;  %v2603_v53 = vpop.permute.xlu0 %2602  ;;  %v2842_v34 = vld [vmem:[%s3863_s5 + $0xec] ss:$16 sps:$4 sm:$0xff]   ;;  %v2846_v12 = vld [vmem:[%s3863_s5 + $0xc8] ss:$16 sps:$4 sm:$0xff]  }
  0xb0   : > { %v2605_v63 = vunpack.i.h.bf16 %v2603_v53  ;;  %v2604_v1 = vunpack.i.l.bf16 %v2603_v53  ;;  %v2593_v14 = vunpack.i.h.bf16 %v2591_v52  ;;  %v2592_v15 = vunpack.i.l.bf16 %v2591_v52  ;;  %1755 = vmatprep.subr.bf16.mxu0 %v2842_v34 }
  0xb1   : > { %v996_v54 = vadd.f32 %v3206_v47, %v957_v50  ;;  %v995_v55 = vadd.f32 %v3206_v47, %v956_v51  ;;  %v993_v56 = vadd.f32 %v3206_v47, %v954_v48  ;;  %v994_v57 = vadd.f32 %v3206_v47, %v955_v49  ;;  %v2854_v50 = vld [vmem:[%s3863_s5 + $0xac] ss:$16 sps:$4 sm:$0xff]  }
  0xb2   : > { %v566_v9 = vmul.f32 %v2604_v1, %v3177_v13  ;;  %v565_v30 = vmul.f32 %v2593_v14, %v3177_v13  ;;  %v564_v31 = vmul.f32 %v2592_v15, %v3177_v13  ;;  %v2858_v1 = vld [vmem:[%s3863_s5 + $0x88] ss:$16 sps:$4 sm:$0xff]  }
  0xb3   : > { %v1028_v58 = vmax.f32 %v996_v54, 0.0  ;;  %v1027_v59 = vmax.f32 %v995_v55, 0.0  ;;  %2821 = vset.pattern.permute.xlu1 %v2981_v18  ;;  %v1025_v60 = vmax.f32 %v993_v56, 0.0  ;;  %v1026_v61 = vmax.f32 %v994_v57, 0.0  ;;  %v2852_v55 = vld [vmem:[%s3863_s5 + $0xa8] ss:$16 sps:$4 sm:$0xff]  }
  0xb4   : > { %2823 = vperm.xlu1 %2821, %v2799_v11   ;;  %v2597_v62 = vpop.permute.xlu1 %2596  ;;  %v2620_v27 = vpop.permute.xlu0 %2619  ;;  %v567_v18 = vmul.f32 %v2605_v63, %v3177_v13  ;;  %v2864_v15 = vld [vmem:[%s3863_s5 + $0x68] ss:$16 sps:$4 sm:$0xff]  }
  0xb5   : > { %v1057_v2 = vpack.c.bf16 %v1026_v61, %v1025_v60  ;;  %v1058_v3 = vpack.c.bf16 %v1028_v58, %v1027_v59  ;;  %v2622_v4 = vunpack.i.h.bf16 %v2620_v27  ;;  %v2621_v5 = vunpack.i.l.bf16 %v2620_v27  ;;  %v2860_v58 = vld [vmem:[%s3863_s5 + $0x8c] ss:$16 sps:$4 sm:$0xff]  }
  0xb6   : > { %v2599_v6 = vunpack.i.h.bf16 %v2597_v62  ;;  %v2598_v7 = vunpack.i.l.bf16 %v2597_v62 }
  0xb7   : > { %2436 = vmatprep.mubr.msk.bf16.mxu0 %vm1112_vm0, %v1057_v2  ;;  %v929_v20 = vmul.f32 %v2622_v4, %v3197_v35  ;;  %v928_v21 = vmul.f32 %v2621_v5, %v3197_v35  ;;  %v2866_v4 = vld [vmem:[%s3863_s5 + $0x6c] ss:$16 sps:$4 sm:$0xff]  }
  0xb8   : > { %v2608_v8 = vpop.permute.xlu1 %2607  ;;  %2437 = vmatmul.mubr.msk.bf16.vlgmr.msra.gmra.mxu0 %vm1112_vm0, %v1058_v3  ;;  %v730_v22 = vmul.f32 %v2599_v6, %v3184_v19  ;;  %v729_v23 = vmul.f32 %v2598_v7, %v3184_v19 }
  0xb9   : > { %v2610_v10 = vunpack.i.h.bf16 %v2608_v8  ;;  %v2609_v11 = vunpack.i.l.bf16 %v2608_v8  ;;  %v2638_v45 = vpop.permute.xlu0 %2637  ;;  %1756 = vmatpush1.bf16.msra.mxu0 %v2840_v29 }
  0xba   : > { %v761_v39 = vadd.f32 %v729_v23, %v564_v31  ;;  %v762_v40 = vadd.f32 %v730_v22, %v565_v30  ;;  %1757 = vmatprep.subr.bf16.mxu0 %v2848_v38  ;;  %v2640_v61 = vunpack.i.h.bf16 %v2638_v45  ;;  %v2639_v62 = vunpack.i.l.bf16 %v2638_v45 }
  0xbb   : > { %v732_v16 = vmul.f32 %v2610_v10, %v3184_v19  ;;  %v731_v17 = vmul.f32 %v2609_v11, %v3184_v19 }
  0xbc   : > { %v571_v8 = vmul.f32 %v2640_v61, %v3177_v13 }
  0xbd   : > { %v763_v24 = vadd.f32 %v731_v17, %v566_v9  ;;  %v764_v25 = vadd.f32 %v732_v16, %v567_v18  ;;  %v2614_v26 = vpop.permute.xlu1 %2613  ;;  %1758 = vmatpush1.bf16.msra.mxu0 %v2846_v12  ;;  %v570_v18 = vmul.f32 %v2639_v62, %v3177_v13 }
  0xbe   : > { %v2616_v32 = vunpack.i.h.bf16 %v2614_v26  ;;  %v2615_v33 = vunpack.i.l.bf16 %v2614_v26  ;;  %1759 = vmatprep.subr.bf16.mxu0 %v2854_v50  ;;  %v2655_v60 = vpop.permute.xlu0 %2654 }
  0xbf   : > { %v960_v36 = vadd.f32 %v928_v21, %v763_v24  ;;  %v961_v37 = vadd.f32 %v929_v20, %v764_v25  ;;  %v2657_v2 = vunpack.i.h.bf16 %v2655_v60  ;;  %v2656_v3 = vunpack.i.l.bf16 %v2655_v60 }
  0xc0   : > { %v927_v41 = vmul.f32 %v2616_v32, %v3197_v35  ;;  %v926_v42 = vmul.f32 %v2615_v33, %v3197_v35 }
  0xc1   : > { %v999_v43 = vadd.f32 %v3206_v47, %v960_v36  ;;  %v1000_v44 = vadd.f32 %v3206_v47, %v961_v37  ;;  %1760 = vmatpush1.bf16.msra.mxu0 %v2852_v55  ;;  %v933_v20 = vmul.f32 %v2657_v2, %v3197_v35  ;;  %v932_v21 = vmul.f32 %v2656_v3, %v3197_v35 }
  0xc2   : > { %v958_v46 = vadd.f32 %v926_v42, %v761_v39  ;;  %v959_v48 = vadd.f32 %v927_v41, %v762_v40  ;;  %v2626_v49 = vpop.permute.xlu1 %2625  ;;  %1761 = vmatprep.subr.bf16.mxu0 %v2860_v58 }
  0xc3   : > { %v1031_v53 = vmax.f32 %v999_v43, 0.0  ;;  %v1032_v54 = vmax.f32 %v1000_v44, 0.0  ;;  %v2628_v11 = vunpack.i.h.bf16 %v2626_v49  ;;  %v2627_v14 = vunpack.i.l.bf16 %v2626_v49  ;;  %v2673_v41 = vpop.permute.xlu0 %2672 }
  0xc4   : > { %v997_v51 = vadd.f32 %v3206_v47, %v958_v46  ;;  %v998_v52 = vadd.f32 %v3206_v47, %v959_v48 }
  0xc5   : > { %v1060_v63 = vpack.c.bf16 %v1032_v54, %v1031_v53  ;;  %1762 = vmatpush1.bf16.msra.mxu0 %v2858_v1  ;;  %v569_v28 = vmul.f32 %v2628_v11, %v3177_v13  ;;  %v568_v29 = vmul.f32 %v2627_v14, %v3177_v13  ;;  %v2675_v53 = vunpack.i.h.bf16 %v2673_v41 }
  0xc6   : > { %v1029_v56 = vmax.f32 %v997_v51, 0.0  ;;  %v1030_v57 = vmax.f32 %v998_v52, 0.0  ;;  %1763 = vmatprep.subr.bf16.mxu0 %v2866_v4  ;;  %v2674_v54 = vunpack.i.l.bf16 %v2673_v41 }
  0xc7   : > { %v2632_v59 = vpop.permute.xlu1 %2631  ;;  %v575_v62 = vmul.f32 %v2675_v53, %v3177_v13 }
  0xc8   : > { %v1059_v27 = vpack.c.bf16 %v1030_v57, %v1029_v56  ;;  %v2634_v5 = vunpack.i.h.bf16 %v2632_v59  ;;  %v2633_v6 = vunpack.i.l.bf16 %v2632_v59  ;;  %v2690_v52 = vpop.permute.xlu0 %2689 }
  0xc9   : > { %1764 = vmatpush1.bf16.msra.mxu0 %v2864_v15  ;;  %v2692_v57 = vunpack.i.h.bf16 %v2690_v52  ;;  %v2691_v58 = vunpack.i.l.bf16 %v2690_v52 }
  0xca   : > { %2440 = vmatprep.mubr.msk.bf16.mxu0 %vm1112_vm0, %v1059_v27  ;;  %v734_v22 = vmul.f32 %v2634_v5, %v3184_v19  ;;  %v733_v23 = vmul.f32 %v2633_v6, %v3184_v19  ;;  %v574_v27 = vmul.f32 %v2674_v54, %v3177_v13 }
  0xcb   : > { %v2643_v7 = vpop.permute.xlu1 %2642  ;;  %2441 = vmatmul.mubr.msk.bf16.gmra.mxu0 %vm1112_vm0, %v1060_v63  ;;  %v937_v6 = vmul.f32 %v2692_v57, %v3197_v35 }
  0xcc   : > { %v2645_v9 = vunpack.i.h.bf16 %v2643_v7  ;;  %v2644_v10 = vunpack.i.l.bf16 %v2643_v7  ;;  %v765_v34 = vadd.f32 %v733_v23, %v568_v29  ;;  %v766_v36 = vadd.f32 %v734_v22, %v569_v28 }
  0xcd   : > { %v936_v7 = vmul.f32 %v2691_v58, %v3197_v35  ;;  %v2708_v29 = vpop.permute.xlu0 %2707 }
  0xce   : > { %v736_v16 = vmul.f32 %v2645_v9, %v3184_v19  ;;  %v735_v17 = vmul.f32 %v2644_v10, %v3184_v19 }
  0xd0   : > { %v767_v24 = vadd.f32 %v735_v17, %v570_v18  ;;  %v768_v25 = vadd.f32 %v736_v16, %v571_v8  ;;  %v2649_v26 = vpop.permute.xlu1 %2648 }
  0xd1   : > { %v2651_v30 = vunpack.i.h.bf16 %v2649_v26  ;;  %v2650_v31 = vunpack.i.l.bf16 %v2649_v26 }
  0xd2   : > { %v964_v32 = vadd.f32 %v932_v21, %v767_v24  ;;  %v965_v33 = vadd.f32 %v933_v20, %v768_v25  ;;  %v2725_v41 = vpop.permute.xlu0 %2724 }
  0xd3   : > { %v931_v37 = vmul.f32 %v2651_v30, %v3197_v35  ;;  %v930_v38 = vmul.f32 %v2650_v31, %v3197_v35 }
  0xd4   : > { %v1003_v39 = vadd.f32 %v3206_v47, %v964_v32  ;;  %v1004_v40 = vadd.f32 %v3206_v47, %v965_v33 }
  0xd5   : > { %v962_v42 = vadd.f32 %v930_v38, %v765_v34  ;;  %v963_v43 = vadd.f32 %v931_v37, %v766_v36  ;;  %v2661_v44 = vpop.permute.xlu1 %2660 }
  0xd6   : > { %v1035_v46 = vmax.f32 %v1003_v39, 0.0  ;;  %v1036_v48 = vmax.f32 %v1004_v40, 0.0  ;;  %v2663_v2 = vunpack.i.h.bf16 %v2661_v44  ;;  %v2662_v3 = vunpack.i.l.bf16 %v2661_v44 }
  0xd7   : > { %v1001_v45 = vadd.f32 %v3206_v47, %v962_v42  ;;  %v1002_v12 = vadd.f32 %v3206_v47, %v963_v43  ;;  %v2710_v42 = vunpack.i.h.bf16 %v2708_v29  ;;  %v2709_v43 = vunpack.i.l.bf16 %v2708_v29 }
  0xd8   : > { %v1062_v56 = vpack.c.bf16 %v1036_v48, %v1035_v46  ;;  %v573_v14 = vmul.f32 %v2663_v2, %v3177_v13  ;;  %v572_v15 = vmul.f32 %v2662_v3, %v3177_v13  ;;  %v2726_v46 = vunpack.i.l.bf16 %v2725_v41 }
  0xd9   : > { %v1033_v49 = vmax.f32 %v1001_v45, 0.0  ;;  %v1034_v50 = vmax.f32 %v1002_v12, 0.0  ;;  %v2727_v12 = vunpack.i.h.bf16 %v2725_v41  ;;  %v578_v52 = vmul.f32 %v2709_v43, %v3177_v13 }
  0xda   : > { %v2667_v51 = vpop.permute.xlu1 %2666 }
  0xdb   : > { %v1061_v55 = vpack.c.bf16 %v1034_v50, %v1033_v49  ;;  %v2669_v59 = vunpack.i.h.bf16 %v2667_v51  ;;  %v2668_v60 = vunpack.i.l.bf16 %v2667_v51  ;;  %v579_v51 = vmul.f32 %v2710_v42, %v3177_v13  ;;  %v2845_v42 = vld [vmem:[%s3863_s5 + $0xc4] ss:$16 sps:$4 sm:$0xff]  }
  0xdd   : > { %2444 = vmatprep.mubr.msk.bf16.mxu0 %vm1112_vm0, %v1061_v55  ;;  %v738_v8 = vmul.f32 %v2669_v59, %v3184_v19  ;;  %v737_v18 = vmul.f32 %v2668_v60, %v3184_v19  ;;  %v941_v59 = vmul.f32 %v2727_v12, %v3197_v35  ;;  %v940_v60 = vmul.f32 %v2726_v46, %v3197_v35 }
  0xde   : > { %v2678_v61 = vpop.permute.xlu1 %2677  ;;  %2445 = vmatmul.mubr.msk.bf16.gmra.mxu0 %vm1112_vm0, %v1062_v56 }
  0xdf   : > { %v2680_v63 = vunpack.i.h.bf16 %v2678_v61  ;;  %v2679_v1 = vunpack.i.l.bf16 %v2678_v61  ;;  %v769_v22 = vadd.f32 %v737_v18, %v572_v15  ;;  %v770_v23 = vadd.f32 %v738_v8, %v573_v14  ;;  %v2870_v18 = vld [vmem:[%s3863_s5 + $0x48] ss:$16 sps:$4 sm:$0xff]  }
  0xe1   : > { %v740_v4 = vmul.f32 %v2680_v63, %v3184_v19  ;;  %v739_v5 = vmul.f32 %v2679_v1, %v3184_v19 }
  0xe3   : > { %v771_v9 = vadd.f32 %v739_v5, %v574_v27  ;;  %v772_v10 = vadd.f32 %v740_v4, %v575_v62  ;;  %v2684_v11 = vpop.permute.xlu1 %2683 }
  0xe4   : > { %v2686_v16 = vunpack.i.h.bf16 %v2684_v11  ;;  %v2685_v17 = vunpack.i.l.bf16 %v2684_v11 }
  0xe5   : > { %v968_v20 = vadd.f32 %v936_v7, %v771_v9  ;;  %v969_v21 = vadd.f32 %v937_v6, %v772_v10  ;;  %v2872_v6 = vld [vmem:[%s3863_s5 + $0x4c] ss:$16 sps:$4 sm:$0xff]  }
  0xe6   : > { %v935_v24 = vmul.f32 %v2686_v16, %v3197_v35  ;;  %v934_v25 = vmul.f32 %v2685_v17, %v3197_v35  ;;  %1765 = vmatprep.subr.bf16.mxu0 %v2872_v6  ;;  %v2743_v17 = vpop.permute.xlu0 %2742  ;;  %v2857_v6 = vld [vmem:[%s3863_s5 + $0x84] ss:$16 sps:$4 sm:$0xff]  }
  0xe7   : > { %v1007_v26 = vadd.f32 %v3206_v47, %v968_v20  ;;  %v1008_v28 = vadd.f32 %v3206_v47, %v969_v21  ;;  %1766 = vmatpush1.bf16.msra.mxu0 %v2870_v18 }
  0xe8   : > { %v966_v30 = vadd.f32 %v934_v25, %v769_v22  ;;  %v967_v31 = vadd.f32 %v935_v24, %v770_v23  ;;  %v2696_v32 = vpop.permute.xlu1 %2695  ;;  %v2878_v23 = vld [vmem:[%s3863_s5 + $0x2c] ss:$16 sps:$4 sm:$0xff]   ;;  %v2876_v24 = vld [vmem:[%s3863_s5 + $0x28] ss:$16 sps:$4 sm:$0xff]  }
  0xe9   : > { %v1039_v36 = vmax.f32 %v1007_v26, 0.0  ;;  %v1040_v37 = vmax.f32 %v1008_v28, 0.0  ;;  %v2698_v55 = vunpack.i.h.bf16 %v2696_v32  ;;  %v2697_v56 = vunpack.i.l.bf16 %v2696_v32  ;;  %1767 = vmatprep.subr.bf16.mxu0 %v2878_v23  ;;  %v2884_v32 = vld [vmem:[%s3863_s5 + $0xc] ss:$16 sps:$4 sm:$0xff]   ;;  %v2863_v23 = vld [vmem:[%s3863_s5 + $0x64] ss:$16 sps:$4 sm:$0xff]  }
  0xea   : > { %v1005_v33 = vadd.f32 %v3206_v47, %v966_v30  ;;  %v1006_v34 = vadd.f32 %v3206_v47, %v967_v31 }
  0xeb   : > { %v1064_v45 = vpack.c.bf16 %v1040_v37, %v1039_v36  ;;  %v577_v2 = vmul.f32 %v2698_v55, %v3177_v13  ;;  %v576_v3 = vmul.f32 %v2697_v56, %v3177_v13  ;;  %1768 = vmatpush1.bf16.msra.mxu0 %v2876_v24  ;;  %v2882_v36 = vld [vmem:[%s3863_s5 + $0x8] ss:$16 sps:$4 sm:$0xff]   ;;  %v2745_v37 = vunpack.i.h.bf16 %v2743_v17  ;;  %v2851_v55 = vld [vmem:[%s3863_s5 + $0xa4] ss:$16 sps:$4 sm:$0xff]  }
  0xec   : > { %v1037_v38 = vmax.f32 %v1005_v33, 0.0  ;;  %v1038_v39 = vmax.f32 %v1006_v34, 0.0  ;;  %v2760_v34 = vpop.permute.xlu0 %2759  ;;  %1769 = vmatprep.subr.bf16.mxu0 %v2884_v32  ;;  %v2869_v32 = vld [vmem:[%s3863_s5 + $0x44] ss:$16 sps:$4 sm:$0xff]  }
  0xed   : > { %v2702_v40 = vpop.permute.xlu1 %2701  ;;  %v2762_v43 = vunpack.i.h.bf16 %v2760_v34 }
  0xee   : > { %v1063_v44 = vpack.c.bf16 %v1038_v39, %v1037_v38  ;;  %v2704_v48 = vunpack.i.h.bf16 %v2702_v40  ;;  %v2703_v49 = vunpack.i.l.bf16 %v2702_v40  ;;  %v2744_v38 = vunpack.i.l.bf16 %v2743_v17  ;;  %v2837_v40 = vld [vmem:[%s3863_s5 + $0xe0] ss:$16 sps:$4 sm:$0xff]  }
  0xef   : > { %1770 = vmatpush1.bf16.msra.mxu0 %v2882_v36  ;;  %v2855_v17 = vld [vmem:[%s3863_s5 + $0x80] ss:$16 sps:$4 sm:$0xff]  }
  0xf0   : > { %2448 = vmatprep.mubr.msk.bf16.mxu0 %vm1112_vm0, %v1063_v44  ;;  %v742_v61 = vmul.f32 %v2704_v48, %v3184_v19  ;;  %v741_v62 = vmul.f32 %v2703_v49, %v3184_v19  ;;  %v2761_v44 = vunpack.i.l.bf16 %v2760_v34  ;;  %v583_v48 = vmul.f32 %v2745_v37, %v3177_v13 }
  0xf1   : > { %v2713_v50 = vpop.permute.xlu1 %2712  ;;  %2449 = vmatmul.mubr.msk.bf16.gmra.mxu0 %vm1112_vm0, %v1064_v45  ;;  %v582_v49 = vmul.f32 %v2744_v38, %v3177_v13 }
  0xf2   : > { %v2715_v53 = vunpack.i.h.bf16 %v2713_v50  ;;  %v2714_v54 = vunpack.i.l.bf16 %v2713_v50  ;;  %1787 = vmatprep.mubr.bf16.mxu0 %v2979_v0  ;;  %v773_v9 = vadd.f32 %v741_v62, %v576_v3  ;;  %v774_v10 = vadd.f32 %v742_v61, %v577_v2 }
  0xf4   : > { %v744_v57 = vmul.f32 %v2715_v53, %v3184_v19  ;;  %v743_v58 = vmul.f32 %v2714_v54, %v3184_v19 }
  0xf6   : > { %v775_v27 = vadd.f32 %v743_v58, %v578_v52  ;;  %v776_v63 = vadd.f32 %v744_v57, %v579_v51  ;;  %v2719_v1 = vpop.permute.xlu1 %2718  ;;  %v2843_v52 = vld [vmem:[%s3863_s5 + $0xc0] ss:$16 sps:$4 sm:$0xff]   ;;  %v945_v58 = vmul.f32 %v2762_v43, %v3197_v35  ;;  %v2875_v43 = vld [vmem:[%s3863_s5 + $0x24] ss:$16 sps:$4 sm:$0xff]  }
  0xf7   : > { %v2721_v4 = vunpack.i.h.bf16 %v2719_v1  ;;  %v2720_v5 = vunpack.i.l.bf16 %v2719_v1  ;;  %v2849_v1 = vld [vmem:[%s3863_s5 + $0xa0] ss:$16 sps:$4 sm:$0xff]  }
  0xf8   : > { %v972_v7 = vadd.f32 %v940_v60, %v775_v27  ;;  %v973_v8 = vadd.f32 %v941_v59, %v776_v63  ;;  %v944_v59 = vmul.f32 %v2761_v44, %v3197_v35 }
  0xf9   : > { %v939_v11 = vmul.f32 %v2721_v4, %v3197_v35  ;;  %v938_v14 = vmul.f32 %v2720_v5, %v3197_v35 }
  0xfa   : > { %v1011_v15 = vadd.f32 %v3206_v47, %v972_v7  ;;  %v1012_v16 = vadd.f32 %v3206_v47, %v973_v8 }
  0xfb   : > { %v970_v20 = vadd.f32 %v938_v14, %v773_v9  ;;  %v971_v21 = vadd.f32 %v939_v11, %v774_v10  ;;  %v2731_v22 = vpop.permute.xlu1 %2730 }
  0xfc   : > { %v1043_v28 = vmax.f32 %v1011_v15, 0.0  ;;  %v1044_v29 = vmax.f32 %v1012_v16, 0.0  ;;  %v2733_v53 = vunpack.i.h.bf16 %v2731_v22  ;;  %v2732_v54 = vunpack.i.l.bf16 %v2731_v22  ;;  %v2778_v16 = vpop.permute.xlu0 %2777 }
  0xfd   : > { %v1009_v25 = vadd.f32 %v3206_v47, %v970_v20  ;;  %v1010_v26 = vadd.f32 %v3206_v47, %v971_v21  ;;  %v2780_v36 = vunpack.i.h.bf16 %v2778_v16  ;;  %v2779_v37 = vunpack.i.l.bf16 %v2778_v16 }
  0xfe   : > { %v1066_v41 = vpack.c.bf16 %v1044_v29, %v1043_v28  ;;  %v581_v2 = vmul.f32 %v2733_v53, %v3177_v13  ;;  %v580_v3 = vmul.f32 %v2732_v54, %v3177_v13  ;;  %v2861_v29 = vld [vmem:[%s3863_s5 + $0x60] ss:$16 sps:$4 sm:$0xff]  }
  0xff   : > { %v1041_v30 = vmax.f32 %v1009_v25, 0.0  ;;  %v1042_v31 = vmax.f32 %v1010_v26, 0.0  ;;  %v2873_v53 = vld [vmem:[%s3863_s5 + $0x20] ss:$16 sps:$4 sm:$0xff]  }
 0x100   : > { %v2737_v33 = vpop.permute.xlu1 %2736  ;;  %v2795_v34 = vpop.permute.xlu0 %2794 }
 0x101   : > { %v1065_v39 = vpack.c.bf16 %v1042_v31, %v1041_v30  ;;  %v2739_v45 = vunpack.i.h.bf16 %v2737_v33  ;;  %v2738_v12 = vunpack.i.l.bf16 %v2737_v33 }
 0x103   : > { %2452 = vmatprep.mubr.msk.bf16.mxu1 %vm1112_vm0, %v1065_v39  ;;  %v746_v60 = vmul.f32 %v2739_v45, %v3184_v19  ;;  %v745_v61 = vmul.f32 %v2738_v12, %v3184_v19 }
 0x104   : > { %v2748_v46 = vpop.permute.xlu1 %2747  ;;  %2453 = vmatmul.mubr.msk.bf16.vlgmr.msra.gmra.mxu1 %vm1112_vm0, %v1066_v41  ;;  %v2797_v41 = vunpack.i.h.bf16 %v2795_v34 }
 0x105   : > { %v2750_v50 = vunpack.i.h.bf16 %v2748_v46  ;;  %v2749_v51 = vunpack.i.l.bf16 %v2748_v46  ;;  %1563 = vmatpush1.bf16.msra.mxu1 %v2837_v40  ;;  %v777_v18 = vadd.f32 %v745_v61, %v580_v3  ;;  %v778_v9 = vadd.f32 %v746_v60, %v581_v2  ;;  %v2867_v40 = vld [vmem:[%s3863_s5 + $0x40] ss:$16 sps:$4 sm:$0xff]  }
 0x106   : > { %1564 = vmatprep.subr.bf16.mxu1 %v2845_v42  ;;  %v2796_v42 = vunpack.i.l.bf16 %v2795_v34  ;;  %v587_v46 = vmul.f32 %v2780_v36, %v3177_v13 }
 0x107   : > { %v748_v56 = vmul.f32 %v2750_v50, %v3184_v19  ;;  %v747_v57 = vmul.f32 %v2749_v51, %v3184_v19 }
 0x109   : > { %v779_v62 = vadd.f32 %v747_v57, %v582_v49  ;;  %v780_v27 = vadd.f32 %v748_v56, %v583_v48  ;;  %v2754_v63 = vpop.permute.xlu1 %2753  ;;  %1565 = vmatpush1.bf16.msra.mxu1 %v2843_v52  ;;  %v586_v48 = vmul.f32 %v2779_v37, %v3177_v13  ;;  %v949_v56 = vmul.f32 %v2797_v41, %v3197_v35 }
 0x10a   : > { %v2756_v4 = vunpack.i.h.bf16 %v2754_v63  ;;  %v2755_v5 = vunpack.i.l.bf16 %v2754_v63  ;;  %1566 = vmatprep.subr.bf16.mxu1 %v2851_v55  ;;  %v948_v57 = vmul.f32 %v2796_v42, %v3197_v35 }
 0x10b   : > { %v976_v7 = vadd.f32 %v944_v59, %v779_v62  ;;  %v977_v8 = vadd.f32 %v945_v58, %v780_v27  ;;  %v2881_v58 = vld [vmem:[%s3863_s5 + $0x4] ss:$16 sps:$4 sm:$0xff]  }
 0x10c   : > { %v943_v10 = vmul.f32 %v2756_v4, %v3197_v35  ;;  %v942_v11 = vmul.f32 %v2755_v5, %v3197_v35  ;;  %v2879_v4 = vld [vmem:[%s3863_s5] ss:$16 sps:$4 sm:$0xff]  }
 0x10d   : > { %v1015_v14 = vadd.f32 %v3206_v47, %v976_v7  ;;  %v1016_v15 = vadd.f32 %v3206_v47, %v977_v8  ;;  %1567 = vmatpush1.bf16.msra.mxu1 %v2849_v1 }
 0x10e   : > { %v974_v20 = vadd.f32 %v942_v11, %v777_v18  ;;  %v975_v21 = vadd.f32 %v943_v10, %v778_v9  ;;  %v2766_v22 = vpop.permute.xlu1 %2765  ;;  %1568 = vmatprep.subr.bf16.mxu1 %v2857_v6 }
 0x10f   : > { %v1047_v26 = vmax.f32 %v1015_v14, 0.0  ;;  %v1048_v28 = vmax.f32 %v1016_v15, 0.0  ;;  %v2768_v51 = vunpack.i.h.bf16 %v2766_v22  ;;  %v2767_v52 = vunpack.i.l.bf16 %v2766_v22  ;;  %v2813_v14 = vpop.permute.xlu0 %2812 }
 0x110   : > { %v1013_v24 = vadd.f32 %v3206_v47, %v974_v20  ;;  %v1014_v25 = vadd.f32 %v3206_v47, %v975_v21 }
 0x111   : > { %1569 = vmatpush1.bf16.msra.mxu1 %v2855_v17  ;;  %v1068_v39 = vpack.c.bf16 %v1048_v28, %v1047_v26  ;;  %v585_v63 = vmul.f32 %v2768_v51, %v3177_v13  ;;  %v584_v1 = vmul.f32 %v2767_v52, %v3177_v13 }
 0x112   : > { %v1045_v30 = vmax.f32 %v1013_v24, 0.0  ;;  %v1046_v31 = vmax.f32 %v1014_v25, 0.0  ;;  %1570 = vmatprep.subr.bf16.mxu1 %v2863_v23 }
 0x113   : > { %v2772_v33 = vpop.permute.xlu1 %2771  ;;  %v2830_v28 = vpop.permute.xlu0 %2829 }
 0x114   : > { %v1067_v38 = vpack.c.bf16 %v1046_v31, %v1045_v30  ;;  %v2774_v44 = vunpack.i.h.bf16 %v2772_v33  ;;  %v2773_v45 = vunpack.i.l.bf16 %v2772_v33  ;;  %v2814_v30 = vunpack.i.l.bf16 %v2813_v14 }
 0x115   : > { %1571 = vmatpush1.bf16.msra.mxu1 %v2861_v29  ;;  %v2815_v29 = vunpack.i.h.bf16 %v2813_v14  ;;  %v2832_v33 = vunpack.i.h.bf16 %v2830_v28  ;;  %v2831_v34 = vunpack.i.l.bf16 %v2830_v28 }
 0x116   : > { %2456 = vmatprep.mubr.msk.bf16.mxu1 %vm1112_vm0, %v1067_v38  ;;  %1572 = vmatprep.subr.bf16.mxu1 %v2869_v32  ;;  %v750_v59 = vmul.f32 %v2774_v44, %v3184_v19  ;;  %v749_v60 = vmul.f32 %v2773_v45, %v3184_v19 }
 0x117   : > { %v2783_v12 = vpop.permute.xlu1 %2782  ;;  %2457 = vmatmul.mubr.msk.bf16.gmra.mxu1 %vm1112_vm0, %v1068_v39  ;;  %v591_v39 = vmul.f32 %v2815_v29, %v3177_v13 }
 0x118   : > { %v2785_v49 = vunpack.i.h.bf16 %v2783_v12  ;;  %v2784_v50 = vunpack.i.l.bf16 %v2783_v12  ;;  %v781_v7 = vadd.f32 %v749_v60, %v584_v1  ;;  %v782_v8 = vadd.f32 %v750_v59, %v585_v63 }
 0x119   : > { %1573 = vmatpush1.bf16.msra.mxu1 %v2867_v40  ;;  %v590_v40 = vmul.f32 %v2814_v30, %v3177_v13 }
 0x11a   : > { %v752_v54 = vmul.f32 %v2785_v49, %v3184_v19  ;;  %v751_v55 = vmul.f32 %v2784_v50, %v3184_v19  ;;  %1574 = vmatprep.subr.bf16.mxu1 %v2875_v43 }
 0x11c   : > { %v783_v61 = vadd.f32 %v751_v55, %v586_v48  ;;  %v784_v62 = vadd.f32 %v752_v54, %v587_v46  ;;  %v2789_v27 = vpop.permute.xlu1 %2788  ;;  %v953_v46 = vmul.f32 %v2832_v33, %v3197_v35  ;;  %v952_v48 = vmul.f32 %v2831_v34, %v3197_v35 }
 0x11d   : > { %v2791_v2 = vunpack.i.h.bf16 %v2789_v27  ;;  %v2790_v3 = vunpack.i.l.bf16 %v2789_v27  ;;  %1575 = vmatpush1.bf16.msra.mxu1 %v2873_v53 }
 0x11e   : > { %v980_v5 = vadd.f32 %v948_v57, %v783_v61  ;;  %v981_v6 = vadd.f32 %v949_v56, %v784_v62  ;;  %1576 = vmatprep.subr.bf16.mxu1 %v2881_v58 }
 0x11f   : > { %v947_v18 = vmul.f32 %v2791_v2, %v3197_v35  ;;  %v946_v9 = vmul.f32 %v2790_v3, %v3197_v35 }
 0x120   : > { %v1019_v10 = vadd.f32 %v3206_v47, %v980_v5  ;;  %v1020_v11 = vadd.f32 %v3206_v47, %v981_v6 }
 0x121   : > { %v978_v15 = vadd.f32 %v946_v9, %v781_v7  ;;  %v979_v16 = vadd.f32 %v947_v18, %v782_v8  ;;  %v2801_v17 = vpop.permute.xlu1 %2800  ;;  %1577 = vmatpush1.bf16.msra.mxu1 %v2879_v4 }
 0x122   : > { %v1051_v22 = vmax.f32 %v1019_v10, 0.0  ;;  %v1052_v23 = vmax.f32 %v1020_v11, 0.0  ;;  %v2803_v43 = vunpack.i.h.bf16 %v2801_v17  ;;  %v2802_v44 = vunpack.i.l.bf16 %v2801_v17  ;;  %v3443_v10 = vld [vmem:[%s3862_s4] ss:$0 sm:$0xff] }
 0x123   : > { %v1017_v20 = vadd.f32 %v3206_v47, %v978_v15  ;;  %v1018_v21 = vadd.f32 %v3206_v47, %v979_v16 }
 0x124   : > { %v1070_v32 = vpack.c.bf16 %v1052_v23, %v1051_v22  ;;  %v589_v54 = vmul.f32 %v2803_v43, %v3177_v13  ;;  %v588_v55 = vmul.f32 %v2802_v44, %v3177_v13 }
 0x125   : > { %v1049_v24 = vmax.f32 %v1017_v20, 0.0  ;;  %v1050_v25 = vmax.f32 %v1018_v21, 0.0 }
 0x126   : > { %v2807_v26 = vpop.permute.xlu1 %2806 }
 0x127   : > { %v1069_v31 = vpack.c.bf16 %v1050_v25, %v1049_v24  ;;  %v2809_v36 = vunpack.i.h.bf16 %v2807_v26  ;;  %v2808_v37 = vunpack.i.l.bf16 %v2807_v26 }
 0x129   : > { %2460 = vmatprep.mubr.msk.bf16.mxu1 %vm1112_vm0, %v1069_v31  ;;  %v754_v49 = vmul.f32 %v2809_v36, %v3184_v19  ;;  %v753_v50 = vmul.f32 %v2808_v37, %v3184_v19 }
 0x12a   : > { %v2818_v38 = vpop.permute.xlu1 %2817  ;;  %2461 = vmatmul.mubr.msk.bf16.gmra.mxu1 %vm1112_vm0, %v1070_v32 }
 0x12b   : > { %v2820_v41 = vunpack.i.h.bf16 %v2818_v38  ;;  %v2819_v42 = vunpack.i.l.bf16 %v2818_v38  ;;  %v785_v60 = vadd.f32 %v753_v50, %v588_v55  ;;  %v786_v61 = vadd.f32 %v754_v49, %v589_v54 }
 0x12d   : > { %v756_v45 = vmul.f32 %v2820_v41, %v3184_v19  ;;  %v755_v12 = vmul.f32 %v2819_v42, %v3184_v19 }
 0x12f   : > { %v787_v51 = vadd.f32 %v755_v12, %v590_v40  ;;  %v788_v52 = vadd.f32 %v756_v45, %v591_v39  ;;  %v2824_v53 = vpop.permute.xlu1 %2823 }
 0x130   : > { %v2826_v56 = vunpack.i.h.bf16 %v2824_v53  ;;  %v2825_v57 = vunpack.i.l.bf16 %v2824_v53 }
 0x131   : > { %v984_v58 = vadd.f32 %v952_v48, %v787_v51  ;;  %v985_v59 = vadd.f32 %v953_v46, %v788_v52 }
 0x132   : > { %v951_v62 = vmul.f32 %v2826_v56, %v3197_v35  ;;  %v950_v27 = vmul.f32 %v2825_v57, %v3197_v35 }
 0x133   : > { %v1023_v63 = vadd.f32 %v3206_v47, %v984_v58  ;;  %v1024_v19 = vadd.f32 %v3206_v47, %v985_v59 }
 0x134   : > { %v982_v1 = vadd.f32 %v950_v27, %v785_v60  ;;  %v983_v2 = vadd.f32 %v951_v62, %v786_v61 }
 0x135   : > { %v1055_v4 = vmax.f32 %v1023_v63, 0.0  ;;  %v1056_v5 = vmax.f32 %v1024_v19, 0.0 }
 0x136   : > { %v1021_v3 = vadd.f32 %v3206_v47, %v982_v1  ;;  %v1022_v13 = vadd.f32 %v3206_v47, %v983_v2 }
 0x137   : > { %v1072_v18 = vpack.c.bf16 %v1056_v5, %v1055_v4 }
 0x138   : > { %v1053_v6 = vmax.f32 %v1021_v3, 0.0  ;;  %v1054_v7 = vmax.f32 %v1022_v13, 0.0 }
 0x13a   : > { %v1071_v8 = vpack.c.bf16 %v1054_v7, %v1053_v6 }
 0x13c   : > { %2464 = vmatprep.mubr.msk.bf16.mxu1 %vm1112_vm0, %v1071_v8 }
 0x13d   : > { %2465 = vmatmul.mubr.msk.bf16.gmra.mxu1 %vm1112_vm0, %v1072_v18 }
 0x13e   : > { %1594 = vmatprep.mubr.bf16.mxu1 %v2979_v0 }
 0x178   : > { %v2438_v35 = vpop.f32.mrf.mxu0 }
 0x179   : > { %v1204_v22 = vadd.f32 %v2438_v35, %v3443_v10 }
 0x17a   : > { %v1195_v9 = vpop.f32.mrf.mxu0 }
 0x17b   : > { %v1196_v11 = vadd.f32 %v3443_v10, %v1195_v9  ;;  %v1324_v24 = vmax.f32 %v1204_v22, 0.0 }
 0x17c   : > { %v2439_v47 = vpop.f32.mrf.mxu0 }
 0x17d   : > { %v1322_v16 = vmax.f32 %v1196_v11, 0.0  ;;  %v1207_v20 = vadd.f32 %v2439_v47, %v3443_v10 }
 0x17e   : > { %v1198_v14 = vpop.f32.mrf.mxu0 }
 0x17f   : > { %v1199_v15 = vadd.f32 %v3443_v10, %v1198_v14  ;;  %v1325_v23 = vmax.f32 %v1207_v20, 0.0 }
 0x181   : > { %v1323_v17 = vmax.f32 %v1199_v15, 0.0  ;;  %v1355_v25 = vpack.c.bf16 %v1325_v23, %v1324_v24 }
 0x183   : > { %v1354_v21 = vpack.c.bf16 %v1323_v17, %v1322_v16 }
 0x185   : > { %1595 = vmatmul.mubr.bf16.vlgmr.msra.gmra.mxu1 %v1354_v21  ;;  %1788 = vmatmul.mubr.bf16.vlgmr.msra.gmra.mxu0 %v1354_v21 }
 0x186   : > { %1604 = vmatprep.mubr.bf16.mxu1 %v2979_v0  ;;  %1797 = vmatprep.mubr.bf16.mxu0 %v2979_v0 }
 0x18b   : > { %v2442_v26 = vpop.f32.mrf.mxu0 }
 0x18c   : > { %v1220_v38 = vadd.f32 %v2442_v26, %v3443_v10 }
 0x18d   : > { %v1211_v28 = vpop.f32.mrf.mxu0  ;;  %1605 = vmatmul.mubr.bf16.gmra.mxu1 %v1355_v25  ;;  %1798 = vmatmul.mubr.bf16.gmra.mxu0 %v1355_v25 }
 0x18e   : > { %1614 = vmatprep.mubr.bf16.mxu1 %v2979_v0  ;;  %1807 = vmatprep.mubr.bf16.mxu0 %v2979_v0  ;;  %v1212_v30 = vadd.f32 %v3443_v10, %v1211_v28  ;;  %v1328_v40 = vmax.f32 %v1220_v38, 0.0 }
 0x18f   : > { %v2443_v29 = vpop.f32.mrf.mxu0 }
 0x190   : > { %v1326_v33 = vmax.f32 %v1212_v30, 0.0  ;;  %v1223_v36 = vadd.f32 %v2443_v29, %v3443_v10 }
 0x191   : > { %v1214_v31 = vpop.f32.mrf.mxu0 }
 0x192   : > { %v1215_v32 = vadd.f32 %v3443_v10, %v1214_v31  ;;  %v1329_v39 = vmax.f32 %v1223_v36, 0.0 }
 0x194   : > { %v1327_v34 = vmax.f32 %v1215_v32, 0.0  ;;  %v1357_v41 = vpack.c.bf16 %v1329_v39, %v1328_v40 }
 0x196   : > { %v1356_v37 = vpack.c.bf16 %v1327_v34, %v1326_v33 }
 0x198   : > { %1615 = vmatmul.mubr.bf16.gmra.mxu1 %v1356_v37  ;;  %1808 = vmatmul.mubr.bf16.gmra.mxu0 %v1356_v37 }
 0x199   : > { %1624 = vmatprep.mubr.bf16.mxu1 %v2979_v0  ;;  %1817 = vmatprep.mubr.bf16.mxu0 %v2979_v0 }
 0x19e   : > { %v2446_v42 = vpop.f32.mrf.mxu0 }
 0x19f   : > { %v1236_v52 = vadd.f32 %v2446_v42, %v3443_v10 }
 0x1a0   : > { %v1227_v43 = vpop.f32.mrf.mxu0  ;;  %1625 = vmatmul.mubr.bf16.gmra.mxu1 %v1357_v41  ;;  %1818 = vmatmul.mubr.bf16.gmra.mxu0 %v1357_v41 }
 0x1a1   : > { %1634 = vmatprep.mubr.bf16.mxu1 %v2979_v0  ;;  %1827 = vmatprep.mubr.bf16.mxu0 %v2979_v0  ;;  %v1228_v45 = vadd.f32 %v3443_v10, %v1227_v43  ;;  %v1332_v54 = vmax.f32 %v1236_v52, 0.0 }
 0x1a2   : > { %v2447_v44 = vpop.f32.mrf.mxu0 }
 0x1a3   : > { %v1330_v48 = vmax.f32 %v1228_v45, 0.0  ;;  %v1239_v50 = vadd.f32 %v2447_v44, %v3443_v10 }
 0x1a4   : > { %v1230_v12 = vpop.f32.mrf.mxu0 }
 0x1a5   : > { %v1231_v46 = vadd.f32 %v3443_v10, %v1230_v12  ;;  %v1333_v53 = vmax.f32 %v1239_v50, 0.0 }
 0x1a7   : > { %v1331_v49 = vmax.f32 %v1231_v46, 0.0  ;;  %v1359_v55 = vpack.c.bf16 %v1333_v53, %v1332_v54 }
 0x1a9   : > { %v1358_v51 = vpack.c.bf16 %v1331_v49, %v1330_v48 }
 0x1ab   : > { %1635 = vmatmul.mubr.bf16.gmra.mxu1 %v1358_v51  ;;  %1828 = vmatmul.mubr.bf16.gmra.mxu0 %v1358_v51 }
 0x1ac   : > { %1644 = vmatprep.mubr.bf16.mxu1 %v2979_v0  ;;  %1837 = vmatprep.mubr.bf16.mxu0 %v2979_v0 }
 0x1b1   : > { %v2450_v56 = vpop.f32.mrf.mxu0 }
 0x1b2   : > { %v1252_v1 = vadd.f32 %v2450_v56, %v3443_v10 }
 0x1b3   : > { %v1243_v57 = vpop.f32.mrf.mxu0  ;;  %1645 = vmatmul.mubr.bf16.gmra.mxu1 %v1359_v55  ;;  %1838 = vmatmul.mubr.bf16.gmra.mxu0 %v1359_v55 }
 0x1b4   : > { %1654 = vmatprep.mubr.bf16.mxu1 %v2979_v0  ;;  %1847 = vmatprep.mubr.bf16.mxu0 %v2979_v0  ;;  %v1244_v59 = vadd.f32 %v3443_v10, %v1243_v57  ;;  %v1336_v3 = vmax.f32 %v1252_v1, 0.0 }
 0x1b5   : > { %v2451_v58 = vpop.f32.mrf.mxu0 }
 0x1b6   : > { %v1334_v62 = vmax.f32 %v1244_v59, 0.0  ;;  %v1255_v63 = vadd.f32 %v2451_v58, %v3443_v10 }
 0x1b7   : > { %v1246_v60 = vpop.f32.mrf.mxu0 }
 0x1b8   : > { %v1247_v61 = vadd.f32 %v3443_v10, %v1246_v60  ;;  %v1337_v2 = vmax.f32 %v1255_v63, 0.0 }
 0x1ba   : > { %v1335_v27 = vmax.f32 %v1247_v61, 0.0  ;;  %v1361_v13 = vpack.c.bf16 %v1337_v2, %v1336_v3 }
 0x1bc   : > { %v1360_v19 = vpack.c.bf16 %v1335_v27, %v1334_v62 }
 0x1be   : > { %1655 = vmatmul.mubr.bf16.gmra.mxu1 %v1360_v19  ;;  %1848 = vmatmul.mubr.bf16.gmra.mxu0 %v1360_v19 }
 0x1bf   : > { %1664 = vmatprep.mubr.bf16.mxu1 %v2979_v0  ;;  %1857 = vmatprep.mubr.bf16.mxu0 %v2979_v0 }
 0x1c4   : > { %v2454_v4 = vpop.f32.mrf.mxu1 }
 0x1c5   : > { %v1268_v14 = vadd.f32 %v2454_v4, %v3443_v10 }
 0x1c6   : > { %v1259_v5 = vpop.f32.mrf.mxu1  ;;  %1665 = vmatmul.mubr.bf16.gmra.mxu1 %v1361_v13  ;;  %1858 = vmatmul.mubr.bf16.gmra.mxu0 %v1361_v13 }
 0x1c7   : > { %1674 = vmatprep.mubr.bf16.mxu1 %v2979_v0  ;;  %1867 = vmatprep.mubr.bf16.mxu0 %v2979_v0  ;;  %v1260_v7 = vadd.f32 %v3443_v10, %v1259_v5  ;;  %v1340_v16 = vmax.f32 %v1268_v14, 0.0 }
 0x1c8   : > { %v2455_v6 = vpop.f32.mrf.mxu1 }
 0x1c9   : > { %v1338_v35 = vmax.f32 %v1260_v7, 0.0  ;;  %v1271_v47 = vadd.f32 %v2455_v6, %v3443_v10 }
 0x1ca   : > { %v1262_v8 = vpop.f32.mrf.mxu1 }
 0x1cb   : > { %v1263_v18 = vadd.f32 %v3443_v10, %v1262_v8  ;;  %v1341_v15 = vmax.f32 %v1271_v47, 0.0 }
 0x1cd   : > { %v1339_v9 = vmax.f32 %v1263_v18, 0.0  ;;  %v1363_v17 = vpack.c.bf16 %v1341_v15, %v1340_v16 }
 0x1cf   : > { %v1362_v11 = vpack.c.bf16 %v1339_v9, %v1338_v35 }
 0x1d1   : > { %1675 = vmatmul.mubr.bf16.gmra.mxu1 %v1362_v11  ;;  %1868 = vmatmul.mubr.bf16.gmra.mxu0 %v1362_v11 }
 0x1d2   : > { %1684 = vmatprep.mubr.bf16.mxu1 %v2979_v0  ;;  %1877 = vmatprep.mubr.bf16.mxu0 %v2979_v0 }
 0x1d7   : > { %v2458_v20 = vpop.f32.mrf.mxu1 }
 0x1d8   : > { %v1284_v31 = vadd.f32 %v2458_v20, %v3443_v10 }
 0x1d9   : > { %v1275_v21 = vpop.f32.mrf.mxu1  ;;  %1685 = vmatmul.mubr.bf16.gmra.mxu1 %v1363_v17  ;;  %1878 = vmatmul.mubr.bf16.gmra.mxu0 %v1363_v17 }
 0x1da   : > { %1694 = vmatprep.mubr.bf16.mxu1 %v2979_v0  ;;  %1887 = vmatprep.mubr.bf16.mxu0 %v2979_v0  ;;  %v1276_v23 = vadd.f32 %v3443_v10, %v1275_v21  ;;  %v1344_v33 = vmax.f32 %v1284_v31, 0.0 }
 0x1db   : > { %v2459_v22 = vpop.f32.mrf.mxu1 }
 0x1dc   : > { %v1342_v26 = vmax.f32 %v1276_v23, 0.0  ;;  %v1287_v29 = vadd.f32 %v2459_v22, %v3443_v10 }
 0x1dd   : > { %v1278_v24 = vpop.f32.mrf.mxu1 }
 0x1de   : > { %v1279_v25 = vadd.f32 %v3443_v10, %v1278_v24  ;;  %v1345_v32 = vmax.f32 %v1287_v29, 0.0  ;;  %v3866_v29 = vlaneseq }
 0x1e0   : > { %v1343_v28 = vmax.f32 %v1279_v25, 0.0  ;;  %v1365_v34 = vpack.c.bf16 %v1345_v32, %v1344_v33  ;;  %vm3571_vm1 = vcmp.lt.s32.totalorder %v3866_v29, 512  ;;  %v2982_v33 = vmov 0.0  }
 0x1e1   : > { %330 = vst.msk [vmem:[%s3579_s22] sm:$0xf] %vm3571_vm1, %v2982_v33 }
 0x1e2   : > { %v1364_v30 = vpack.c.bf16 %v1343_v28, %v1342_v26 }
 0x1e4   : > { %1695 = vmatmul.mubr.bf16.gmra.mxu1 %v1364_v30  ;;  %1888 = vmatmul.mubr.bf16.gmra.mxu0 %v1364_v30  ;;  %v3872_v30 = vmov 0 }
 0x1e5   : > { %1704 = vmatprep.mubr.bf16.mxu1 %v2979_v0  ;;  %1897 = vmatprep.mubr.bf16.mxu0 %v2979_v0  ;;  %v3873_v30 = vsel %vm3571_vm1, 4294967295, %v3872_v30 }
 0x1e6   : > { %3874 = vst [vmem:[#allocation5_spill] sm:$0xff] %v3873_v30 }
 0x1ea   : > { %v2462_v36 = vpop.f32.mrf.mxu1 }
 0x1eb   : > { %v1300_v12 = vadd.f32 %v2462_v36, %v3443_v10 }
 0x1ec   : > { %v1291_v37 = vpop.f32.mrf.mxu1  ;;  %1705 = vmatmul.mubr.bf16.gmra.mxu1 %v1365_v34  ;;  %1898 = vmatmul.mubr.bf16.gmra.mxu0 %v1365_v34 }
 0x1ed   : > { %1714 = vmatprep.mubr.bf16.mxu1 %v2979_v0  ;;  %1907 = vmatprep.mubr.bf16.mxu0 %v2979_v0  ;;  %v1292_v39 = vadd.f32 %v3443_v10, %v1291_v37  ;;  %v1348_v48 = vmax.f32 %v1300_v12, 0.0 }
 0x1ee   : > { %v2463_v38 = vpop.f32.mrf.mxu1 }
 0x1ef   : > { %v1346_v42 = vmax.f32 %v1292_v39, 0.0  ;;  %v1303_v44 = vadd.f32 %v2463_v38, %v3443_v10 }
 0x1f0   : > { %v1294_v40 = vpop.f32.mrf.mxu1 }
 0x1f1   : > { %v1295_v41 = vadd.f32 %v3443_v10, %v1294_v40  ;;  %v1349_v46 = vmax.f32 %v1303_v44, 0.0 }
 0x1f3   : > { %v1347_v43 = vmax.f32 %v1295_v41, 0.0  ;;  %v1367_v49 = vpack.c.bf16 %v1349_v46, %v1348_v48 }
 0x1f5   : > { %v1366_v45 = vpack.c.bf16 %v1347_v43, %v1346_v42 }
 0x1f7   : > { %1715 = vmatmul.mubr.bf16.gmra.mxu1 %v1366_v45  ;;  %1908 = vmatmul.mubr.bf16.gmra.mxu0 %v1366_v45 }
 0x1f8   : > { %1724 = vmatprep.mubr.bf16.mxu1 %v2979_v0  ;;  %1917 = vmatprep.mubr.bf16.mxu0 %v2979_v0 }
 0x1fd   : > { %v2466_v50 = vpop.f32.mrf.mxu1 }
 0x1fe   : > { %v1316_v60 = vadd.f32 %v2466_v50, %v3443_v10 }
 0x1ff   : > { %v1307_v51 = vpop.f32.mrf.mxu1  ;;  %1725 = vmatmul.mubr.bf16.gmra.mxu1 %v1367_v49  ;;  %1918 = vmatmul.mubr.bf16.gmra.mxu0 %v1367_v49 }
 0x200   : > { %1734 = vmatprep.mubr.bf16.mxu1 %v2979_v0  ;;  %1927 = vmatprep.mubr.bf16.mxu0 %v2979_v0  ;;  %v1308_v53 = vadd.f32 %v3443_v10, %v1307_v51  ;;  %v1352_v62 = vmax.f32 %v1316_v60, 0.0 }
 0x201   : > { %v2467_v52 = vpop.f32.mrf.mxu1 }
 0x202   : > { %v1350_v56 = vmax.f32 %v1308_v53, 0.0  ;;  %v1319_v58 = vadd.f32 %v2467_v52, %v3443_v10 }
 0x203   : > { %v1310_v54 = vpop.f32.mrf.mxu1 }
 0x204   : > { %v1311_v55 = vadd.f32 %v3443_v10, %v1310_v54  ;;  %v1353_v61 = vmax.f32 %v1319_v58, 0.0 }
 0x206   : > { %v1351_v57 = vmax.f32 %v1311_v55, 0.0  ;;  %v1369_v27 = vpack.c.bf16 %v1353_v61, %v1352_v62 }
 0x208   : > { %v1368_v59 = vpack.c.bf16 %v1351_v57, %v1350_v56 }
 0x20a   : > { %1735 = vmatmul.mubr.bf16.gmra.mxu1 %v1368_v59  ;;  %1928 = vmatmul.mubr.bf16.gmra.mxu0 %v1368_v59 }
 0x20b   : > { %1744 = vmatprep.mubr.bf16.mxu1 %v2979_v0  ;;  %1937 = vmatprep.mubr.bf16.mxu0 %v2979_v0 }
 0x212   : > { %1745 = vmatmul.mubr.bf16.gmra.mxu1 %v1369_v27  ;;  %1938 = vmatmul.mubr.bf16.gmra.mxu0 %v1369_v27 }
 0x245   : > { %v3507_v63 = vpop.f32.mrf.mxu1  ;;  %v3509_v19 = vpop.f32.mrf.mxu0 }
 0x247   : > { %v3511_v1 = vpop.f32.mrf.mxu1  ;;  %v3513_v2 = vpop.f32.mrf.mxu0 }
 0x249   : > { %v3515_v10 = vpop.f32.mrf.mxu1  ;;  %v3517_v3 = vpop.f32.mrf.mxu0 }
 0x24b   : > { %v3519_v13 = vpop.f32.mrf.mxu1  ;;  %v3521_v0 = vpop.f32.mrf.mxu0 }
 0x24d   : > { %v3523_v4 = vpop.f32.mrf.mxu1  ;;  %v3525_v5 = vpop.f32.mrf.mxu0 }
 0x24f   : > { %v3527_v6 = vpop.f32.mrf.mxu1  ;;  %v3529_v7 = vpop.f32.mrf.mxu0 }
 0x251   : > { %v3531_v8 = vpop.f32.mrf.mxu1  ;;  %v3533_v18 = vpop.f32.mrf.mxu0 }
 0x253   : > { %v3535_v35 = vpop.f32.mrf.mxu1  ;;  %v3537_v9 = vpop.f32.mrf.mxu0 }
 0x258   : > { %v3539_v47 = vpop.f32.mrf.mxu1  ;;  %v3541_v11 = vpop.f32.mrf.mxu0 }
 0x25a   : > { %v3543_v14 = vpop.f32.mrf.mxu1  ;;  %v3545_v15 = vpop.f32.mrf.mxu0 }
 0x25c   : > { %v3547_v16 = vpop.f32.mrf.mxu1  ;;  %v3549_v17 = vpop.f32.mrf.mxu0 }
 0x25e   : > { %v3551_v20 = vpop.f32.mrf.mxu1  ;;  %v3553_v21 = vpop.f32.mrf.mxu0 }
 0x260   : > { %v3555_v22 = vpop.f32.mrf.mxu1  ;;  %v3557_v23 = vpop.f32.mrf.mxu0 }
 0x262   : > { %v3559_v24 = vpop.f32.mrf.mxu1  ;;  %v3561_v25 = vpop.f32.mrf.mxu0 }
 0x264   : > { %v3563_v26 = vpop.f32.mrf.mxu1  ;;  %v3565_v28 = vpop.f32.mrf.mxu0 }
 0x266   : > { %v3575_v31 = vpop.f32.mrf.mxu1  ;;  %v3577_v32 = vpop.f32.mrf.mxu0 }
 0x26b   : > { %v3584_v34 = vpop.f32.mrf.mxu1  ;;  %v3586_v36 = vpop.f32.mrf.mxu0 }
 0x26d   : > { %v3588_v37 = vpop.f32.mrf.mxu1  ;;  %v3590_v38 = vpop.f32.mrf.mxu0 }
 0x26f   : > { %v3592_v39 = vpop.f32.mrf.mxu1  ;;  %v3594_v40 = vpop.f32.mrf.mxu0 }
 0x271   : > { %v3596_v41 = vpop.f32.mrf.mxu1  ;;  %v3598_v42 = vpop.f32.mrf.mxu0 }
 0x273   : > { %v3600_v43 = vpop.f32.mrf.mxu1  ;;  %v3602_v44 = vpop.f32.mrf.mxu0 }
 0x275   : > { %v3604_v45 = vpop.f32.mrf.mxu1  ;;  %v3606_v12 = vpop.f32.mrf.mxu0 }
 0x277   : > { %v3608_v46 = vpop.f32.mrf.mxu1  ;;  %v3610_v48 = vpop.f32.mrf.mxu0 }
 0x279   : > { %v3612_v49 = vpop.f32.mrf.mxu1  ;;  %v3614_v50 = vpop.f32.mrf.mxu0 }
 0x27e   : > { %v3616_v51 = vpop.f32.mrf.mxu1  ;;  %v3618_v52 = vpop.f32.mrf.mxu0 }
 0x280   : > { %v3620_v53 = vpop.f32.mrf.mxu1  ;;  %v3622_v54 = vpop.f32.mrf.mxu0 }
 0x282   : > { %v3624_v55 = vpop.f32.mrf.mxu1  ;;  %v3626_v56 = vpop.f32.mrf.mxu0 }
 0x283   : > { %3875 = vst [vmem:[#allocation6_spill] sm:$0xff] %v3626_v56 }
 0x284   : > { %v3628_v57 = vpop.f32.mrf.mxu1  ;;  %v3630_v58 = vpop.f32.mrf.mxu0 }
 0x285   : > { %3876 = vst [vmem:[#allocation7_spill] sm:$0xff] %v3628_v57  ;;  %3877 = vst [vmem:[#allocation8_spill] sm:$0xff] %v3630_v58 }
 0x286   : > { %v3632_v59 = vpop.f32.mrf.mxu1  ;;  %v3634_v60 = vpop.f32.mrf.mxu0 }
 0x287   : > { %3878 = vst [vmem:[#allocation9_spill] sm:$0xff] %v3632_v59  ;;  %3879 = vst [vmem:[#allocation10_spill] sm:$0xff] %v3634_v60 }
 0x288   : > { %v3636_v61 = vpop.f32.mrf.mxu1  ;;  %v3638_v62 = vpop.f32.mrf.mxu0 }
 0x289   : > { %3880 = vst [vmem:[#allocation11_spill] sm:$0xff] %v3636_v61  ;;  %3881 = vst [vmem:[#allocation12_spill] sm:$0xff] %v3638_v62 }
 0x28a   : > { %v3640_v27 = vpop.f32.mrf.mxu1  ;;  %v3642_v33 = vpop.f32.mrf.mxu0 }
 0x28b   : > { %3882 = vst [vmem:[#allocation13_spill] sm:$0xff] %v3640_v27  ;;  %3883 = vst [vmem:[#allocation14_spill] sm:$0xff] %v3642_v33 }
 0x28c   : > { %v3644_v29 = vpop.f32.mrf.mxu1  ;;  %v3646_v30 = vpop.f32.mrf.mxu0 }
 0x28d   : > { %3884 = vst [vmem:[#allocation15_spill] sm:$0xff] %v3644_v29 }
 0x291   : > { %v3648_v56 = vpop.f32.mrf.mxu1  ;;  %v3650_v57 = vpop.f32.mrf.mxu0 }
 0x292   : > { %3885 = vst [vmem:[#allocation16_spill] sm:$0xff] %v3648_v56  ;;  %3886 = vst [vmem:[#allocation17_spill] sm:$0xff] %v3650_v57  ;;  %v1948_v56 = vmax.f32 %v3507_v63, %v3515_v10 }
 0x293   : > { %v3652_v58 = vpop.f32.mrf.mxu1  ;;  %v3654_v59 = vpop.f32.mrf.mxu0 }
 0x294   : > { %3887 = vst [vmem:[#allocation18_spill] sm:$0xff] %v3652_v58  ;;  %3888 = vst [vmem:[#allocation19_spill] sm:$0xff] %v3654_v59  ;;  %v2022_v58 = vmax.f32 %v3509_v19, %v3517_v3 }
 0x295   : > { %v3656_v60 = vpop.f32.mrf.mxu1  ;;  %v3658_v61 = vpop.f32.mrf.mxu0 }
 0x296   : > { %3889 = vst [vmem:[#allocation20_spill] sm:$0xff] %v3658_v61  ;;  %v1985_v61 = vmax.f32 %v3511_v1, %v3519_v13 }
 0x297   : > { %v3660_v62 = vpop.f32.mrf.mxu1  ;;  %v3662_v27 = vpop.f32.mrf.mxu0 }
 0x298   : > { %3890 = vst [vmem:[#allocation21_spill] sm:$0xff] %v3660_v62  ;;  %3891 = vst [vmem:[#allocation22_spill] sm:$0xff] %v3662_v27  ;;  %v2059_v27 = vmax.f32 %v3513_v2, %v3521_v0  ;;  %v1986_v19 = vmax.f32 %v1985_v61, %v3527_v6 }
 0x299   : > { %v3664_v33 = vpop.f32.mrf.mxu1  ;;  %v3666_v29 = vpop.f32.mrf.mxu0 }
 0x29a   : > { %3892 = vst [vmem:[#allocation23_spill] sm:$0xff] %v3664_v33  ;;  %3893 = vst [vmem:[#allocation24_spill] sm:$0xff] %v3666_v29  ;;  %v1949_v33 = vmax.f32 %v1948_v56, %v3523_v4  ;;  %v2023_v29 = vmax.f32 %v2022_v58, %v3525_v5  ;;  %v2060_v10 = vmax.f32 %v2059_v27, %v3529_v7 }
 0x29b   : > { %v3672_v57 = vpop.f32.mrf.mxu1  ;;  %v3674_v59 = vpop.f32.mrf.mxu0  ;;  %v1987_v1 = vmax.f32 %v1986_v19, %v3535_v35 }
 0x29c   : > { %3894 = vst [vmem:[#allocation25_spill] sm:$0xff] %v3674_v59  ;;  %v1950_v3 = vmax.f32 %v1949_v33, %v3531_v8  ;;  %v2024_v59 = vmax.f32 %v2023_v29, %v3533_v18  ;;  %v2061_v2 = vmax.f32 %v2060_v10, %v3537_v9 }
 0x29d   : > { %v3682_v62 = vpop.f32.mrf.mxu1  ;;  %v3684_v63 = vpop.f32.mrf.mxu0  ;;  %v1988_v6 = vmax.f32 %v1987_v1, %v3543_v14 }
 0x29e   : > { %v1951_v13 = vmax.f32 %v1950_v3, %v3539_v47  ;;  %v2025_v0 = vmax.f32 %v2024_v59, %v3541_v11  ;;  %v2062_v7 = vmax.f32 %v2061_v2, %v3545_v15 }
 0x29f   : > { %v3694_v4 = vpop.f32.mrf.mxu1  ;;  %v3696_v5 = vpop.f32.mrf.mxu0  ;;  %v1989_v9 = vmax.f32 %v1988_v6, %v3551_v20  ;;  %v3895_v6 = vld [vmem:[#allocation6_spill] sm:$0xff] }
 0x2a0   : > { %v1952_v8 = vmax.f32 %v1951_v13, %v3547_v16  ;;  %v2026_v18 = vmax.f32 %v2025_v0, %v3549_v17  ;;  %v2063_v47 = vmax.f32 %v2062_v7, %v3553_v21  ;;  %v3896_v7 = vld [vmem:[#allocation7_spill] sm:$0xff] }
 0x2a1   : > { %v1990_v15 = vmax.f32 %v1989_v9, %v3559_v24  ;;  %v3899_v9 = vld [vmem:[#allocation10_spill] sm:$0xff] }
 0x2a2   : > { %v1953_v11 = vmax.f32 %v1952_v8, %v3555_v22  ;;  %v2027_v56 = vmax.f32 %v2026_v18, %v3557_v23  ;;  %v2064_v16 = vmax.f32 %v2063_v47, %v3561_v25  ;;  %v3897_v8 = vld [vmem:[#allocation8_spill] sm:$0xff]  ;;  %v3898_v18 = vld [vmem:[#allocation9_spill] sm:$0xff] }
 0x2a3   : > { %v1991_v21 = vmax.f32 %v1990_v15, %v3575_v31 }
 0x2a4   : > { %v3702_v29 = vpop.f32.mrf.mxu1  ;;  %v3704_v35 = vpop.f32.mrf.mxu0  ;;  %v1954_v17 = vmax.f32 %v1953_v11, %v3563_v26  ;;  %v2028_v59 = vmax.f32 %v2027_v56, %v3565_v28  ;;  %v2065_v22 = vmax.f32 %v2064_v16, %v3577_v32  ;;  %v3900_v56 = vld [vmem:[#allocation11_spill] sm:$0xff]  ;;  %v3901_v16 = vld [vmem:[#allocation12_spill] sm:$0xff] }
 0x2a5   : > { %v1992_v25 = vmax.f32 %v1991_v21, %v3588_v37 }
 0x2a6   : > { %v3710_v58 = vpop.f32.mrf.mxu1  ;;  %v3712_v14 = vpop.f32.mrf.mxu0  ;;  %v1955_v23 = vmax.f32 %v1954_v17, %v3584_v34  ;;  %v2029_v27 = vmax.f32 %v2028_v59, %v3586_v36  ;;  %v2066_v26 = vmax.f32 %v2065_v22, %v3590_v38  ;;  %v3902_v17 = vld [vmem:[#allocation13_spill] sm:$0xff]  ;;  %v3903_v59 = vld [vmem:[#allocation14_spill] sm:$0xff] }
 0x2a7   : > { %v1993_v32 = vmax.f32 %v1992_v25, %v3596_v41 }
 0x2a8   : > { %v3718_v61 = vpop.f32.mrf.mxu1  ;;  %v3720_v20 = vpop.f32.mrf.mxu0  ;;  %v1956_v28 = vmax.f32 %v1955_v23, %v3592_v39  ;;  %v2030_v19 = vmax.f32 %v2029_v27, %v3594_v40  ;;  %v2067_v34 = vmax.f32 %v2066_v26, %v3598_v42  ;;  %v3904_v23 = vld [vmem:[#allocation15_spill] sm:$0xff]  ;;  %v3905_v26 = vld [vmem:[#allocation16_spill] sm:$0xff] }
 0x2a9   : > { %v1994_v38 = vmax.f32 %v1993_v32, %v3604_v45 }
 0x2aa   : > { %v3726_v33 = vpop.f32.mrf.mxu1  ;;  %v3728_v24 = vpop.f32.mrf.mxu0  ;;  %v1957_v36 = vmax.f32 %v1956_v28, %v3600_v43  ;;  %v2031_v3 = vmax.f32 %v2030_v19, %v3602_v44  ;;  %v2068_v39 = vmax.f32 %v2067_v34, %v3606_v12  ;;  %v3906_v19 = vld [vmem:[#allocation17_spill] sm:$0xff] }
 0x2ab   : > { %v1995_v41 = vmax.f32 %v1994_v38, %v3612_v49 }
 0x2ac   : > { %v3734_v10 = vpop.f32.mrf.mxu1  ;;  %v3736_v31 = vpop.f32.mrf.mxu0  ;;  %v1958_v40 = vmax.f32 %v1957_v36, %v3608_v46  ;;  %v2032_v2 = vmax.f32 %v2031_v3, %v3610_v48  ;;  %v2069_v42 = vmax.f32 %v2068_v39, %v3614_v50  ;;  %v3907_v3 = vld [vmem:[#allocation18_spill] sm:$0xff]  ;;  %v3908_v39 = vld [vmem:[#allocation19_spill] sm:$0xff] }
 0x2ad   : > { %v1996_v45 = vmax.f32 %v1995_v41, %v3620_v53  ;;  %v3909_v41 = vld [vmem:[#allocation20_spill] sm:$0xff] }
 0x2ae   : > { %v3742_v1 = vpop.f32.mrf.mxu1  ;;  %v3744_v37 = vpop.f32.mrf.mxu0  ;;  %v1959_v43 = vmax.f32 %v1958_v40, %v3616_v51  ;;  %v2033_v44 = vmax.f32 %v2032_v2, %v3618_v52  ;;  %v2070_v12 = vmax.f32 %v2069_v42, %v3622_v54 }
 0x2af   : > { %v1997_v49 = vmax.f32 %v1996_v45, %v3896_v7  ;;  %v3910_v45 = vld [vmem:[#allocation21_spill] sm:$0xff]  ;;  %v3913_v7 = vld [vmem:[#allocation24_spill] sm:$0xff] }
 0x2b0   : > { %v3754_v13 = vpop.f32.mrf.mxu1  ;;  %v3756_v0 = vpop.f32.mrf.mxu0  ;;  %v1960_v46 = vmax.f32 %v1959_v43, %v3624_v55  ;;  %v2034_v48 = vmax.f32 %v2033_v44, %v3895_v6  ;;  %v2071_v50 = vmax.f32 %v2070_v12, %v3897_v8  ;;  %v3912_v6 = vld [vmem:[#allocation23_spill] sm:$0xff] }
 0x2b1   : > { %v1998_v15 = vmax.f32 %v1997_v49, %v3900_v56 }
 0x2b2   : > { %v1961_v51 = vmax.f32 %v1960_v46, %v3898_v18  ;;  %v2035_v52 = vmax.f32 %v2034_v48, %v3899_v9  ;;  %v1712_v47 = vpop.f32.mrf.mxu1  ;;  %v1905_v11 = vpop.f32.mrf.mxu0  ;;  %v2072_v53 = vmax.f32 %v2071_v50, %v3901_v16  ;;  %v3911_v46 = vld [vmem:[#allocation22_spill] sm:$0xff] }
 0x2b3   : > { %v1999_v27 = vmax.f32 %v1998_v15, %v3904_v23 }
 0x2b4   : > { %v1962_v54 = vmax.f32 %v1961_v51, %v3902_v17  ;;  %v2036_v55 = vmax.f32 %v2035_v52, %v3903_v59  ;;  %v2073_v25 = vmax.f32 %v2072_v53, %v3646_v30  ;;  %v3914_v51 = vld [vmem:[#allocation25_spill] sm:$0xff] }
 0x2b5   : > { %v2000_v38 = vmax.f32 %v1999_v27, %v3907_v3 }
 0x2b6   : > { %v1963_v28 = vmax.f32 %v1962_v54, %v3905_v26  ;;  %v2037_v32 = vmax.f32 %v2036_v55, %v3906_v19  ;;  %v2074_v40 = vmax.f32 %v2073_v25, %v3908_v39 }
 0x2b7   : > { %v1716_v21 = vpop.f32.mrf.mxu1  ;;  %v1909_v22 = vpop.f32.mrf.mxu0  ;;  %v2001_v12 = vmax.f32 %v2000_v38, %v3910_v45 }
 0x2b8   : > { %v1964_v2 = vmax.f32 %v1963_v28, %v3656_v60  ;;  %v2038_v42 = vmax.f32 %v2037_v32, %v3909_v41  ;;  %v2075_v30 = vmax.f32 %v2074_v40, %v3911_v46 }
 0x2b9   : > { %v1718_v34 = vpop.f32.mrf.mxu1  ;;  %v1911_v36 = vpop.f32.mrf.mxu0  ;;  %v2002_v18 = vmax.f32 %v2001_v12, %v3672_v57 }
 0x2ba   : > { %v1965_v48 = vmax.f32 %v1964_v2, %v3912_v6  ;;  %v2039_v49 = vmax.f32 %v2038_v42, %v3913_v7  ;;  %v2076_v9 = vmax.f32 %v2075_v30, %v3914_v51 }
 0x2bb   : > { %v1720_v43 = vpop.f32.mrf.mxu1  ;;  %v1913_v44 = vpop.f32.mrf.mxu0  ;;  %v2003_v16 = vmax.f32 %v2002_v18, %v3694_v4 }
 0x2bc   : > { %v1966_v60 = vmax.f32 %v1965_v48, %v3682_v62  ;;  %v2040_v52 = vmax.f32 %v2039_v49, %v3684_v63  ;;  %v2077_v53 = vmax.f32 %v2076_v9, %v3696_v5 }
 0x2bd   : > { %v1722_v8 = vpop.f32.mrf.mxu1  ;;  %v1915_v50 = vpop.f32.mrf.mxu0  ;;  %v2004_v57 = vmax.f32 %v2003_v16, %v3710_v58 }
 0x2be   : > { %v1967_v17 = vmax.f32 %v1966_v60, %v3702_v29  ;;  %v2041_v54 = vmax.f32 %v2040_v52, %v3704_v35  ;;  %v2078_v23 = vmax.f32 %v2077_v53, %v3712_v14 }
 0x2bf   : > { %v1726_v56 = vpop.f32.mrf.mxu1  ;;  %v1919_v15 = vpop.f32.mrf.mxu0  ;;  %v2005_v4 = vmax.f32 %v2004_v57, %v3726_v33 }
 0x2c0   : > { %v1968_v62 = vmax.f32 %v1967_v17, %v3718_v61  ;;  %v2042_v63 = vmax.f32 %v2041_v54, %v3720_v20  ;;  %v2079_v5 = vmax.f32 %v2078_v23, %v3728_v24 }
 0x2c1   : > { %v1728_v59 = vpop.f32.mrf.mxu1  ;;  %v1921_v55 = vpop.f32.mrf.mxu0  ;;  %v2006_v26 = vmax.f32 %v2005_v4, %v3742_v1 }
 0x2c2   : > { %v1969_v29 = vmax.f32 %v1968_v62, %v3734_v10  ;;  %v2043_v35 = vmax.f32 %v2042_v63, %v3736_v31  ;;  %v2080_v58 = vmax.f32 %v2079_v5, %v3744_v37 }
 0x2c3   : > { %v1730_v27 = vpop.f32.mrf.mxu1  ;;  %v1923_v25 = vpop.f32.mrf.mxu0  ;;  %v2007_v19 = vmax.f32 %v2006_v26, %v1712_v47 }
 0x2c4   : > { %v1970_v14 = vmax.f32 %v1969_v29, %v3754_v13  ;;  %v2044_v61 = vmax.f32 %v2043_v35, %v3756_v0  ;;  %v2081_v32 = vmax.f32 %v2080_v58, %v1905_v11 }
 0x2c5   : > { %v1732_v28 = vpop.f32.mrf.mxu1  ;;  %v1925_v20 = vpop.f32.mrf.mxu0  ;;  %v2008_v39 = vmax.f32 %v2007_v19, %v1718_v34 }
 0x2c6   : > { %v1971_v3 = vmax.f32 %v1970_v14, %v1716_v21  ;;  %v2045_v33 = vmax.f32 %v2044_v61, %v1909_v22  ;;  %v2082_v10 = vmax.f32 %v2081_v32, %v1911_v36  ;;  %v2097_v61 = vld [vmem:[%s3864_s6] sm:$0xf] }
 0x2c7   : > { %v2009_v41 = vmax.f32 %v2008_v39, %v1722_v8 }
 0x2c8   : > { %v1972_v40 = vmax.f32 %v1971_v3, %v1720_v43  ;;  %v2046_v31 = vmax.f32 %v2045_v33, %v1913_v44  ;;  %v2083_v37 = vmax.f32 %v2082_v10, %v1915_v50  ;;  %v2983_v3 = vmov 1966171168  }
 0x2c9   : > { %v2010_v12 = vmax.f32 %v2009_v41, %v1728_v59  ;;  %v3915_v59 = vlaneseq  ;;  %v2130_v33 = vunpack.c.l.s4 %v2983_v3 }
 0x2ca   : > { %v1736_v38 = vpop.f32.mrf.mxu1  ;;  %v1929_v24 = vpop.f32.mrf.mxu0  ;;  %v1973_v42 = vmax.f32 %v1972_v40, %v1726_v56  ;;  %v2047_v13 = vmax.f32 %v2046_v31, %v1919_v15  ;;  %v2084_v46 = vmax.f32 %v2083_v37, %v1921_v55 }
 0x2cb   : > { %v2011_v30 = vmax.f32 %v2010_v12, %v1732_v28  ;;  %v2100_v55 = vshrl.u32 %v3915_v59, 7 }
 0x2cc   : > { %v1738_v2 = vpop.f32.mrf.mxu1  ;;  %v1931_v1 = vpop.f32.mrf.mxu0  ;;  %v1974_v47 = vmax.f32 %v1973_v42, %v1730_v27  ;;  %v2048_v11 = vmax.f32 %v2047_v13, %v1923_v25  ;;  %v2085_v6 = vmax.f32 %v2084_v46, %v1925_v20 }
 0x2cd   : > { %v2012_v48 = vmax.f32 %v2011_v30, %v1738_v2  ;;  %v2101_v26 = vsub.s32 0, %v2100_v55  ;;  %v2109_v58 = vsub.s32 2, %v2100_v55  ;;  %v2105_v32 = vsub.s32 1, %v2100_v55 }
 0x2ce   : > { %v1740_v45 = vpop.f32.mrf.mxu1  ;;  %v1933_v0 = vpop.f32.mrf.mxu0  ;;  %v1975_v34 = vmax.f32 %v1974_v47, %v1736_v38  ;;  %v2049_v36 = vmax.f32 %v2048_v11, %v1929_v24  ;;  %v2086_v7 = vmax.f32 %v2085_v6, %v1931_v1  ;;  %v2113_v38 = vsub.s32 3, %v2100_v55 }
 0x2cf   : > { %v2102_v31 = vrot.slane %v2097_v61, %v2101_v26  ;;  %v2110_v2 = vrot.slane %v2097_v61, %v2109_v58  ;;  %v2106_v13 = vrot.slane %v2097_v61, %v2105_v32 }
 0x2d0   : > { %v1742_v21 = vpop.f32.mrf.mxu1  ;;  %v1935_v22 = vpop.f32.mrf.mxu0  ;;  %v1976_v49 = vmax.f32 %v1975_v34, %v1740_v45  ;;  %v2050_v8 = vmax.f32 %v2049_v36, %v1933_v0  ;;  %v2131_v45 = vunpack.c.0.s8 %v2130_v33  ;;  %v2114_v0 = vrot.slane %v2097_v61, %v2113_v38 }
 0x2d1   : > { %v2013_v51 = vmax.f32 %v2012_v48, %v1742_v21  ;;  %v2087_v9 = vmax.f32 %v2086_v7, %v1935_v22 }
 0x2d2   : > { %v1746_v43 = vpop.f32.mrf.mxu1  ;;  %v1939_v44 = vpop.f32.mrf.mxu0  ;;  %v2134_v36 = vsub.s32 %v2131_v45, %v2100_v55 }
 0x2d3   : > { %v1977_v60 = vmax.f32 %v1976_v49, %v1746_v43  ;;  %v2051_v52 = vmax.f32 %v2050_v8, %v1939_v44 }
 0x2d4   : > { %v1748_v50 = vpop.f32.mrf.mxu1  ;;  %v1941_v18 = vpop.f32.mrf.mxu0 }
 0x2d5   : > { %v2014_v16 = vmax.f32 %v2013_v51, %v1748_v50  ;;  %v2088_v53 = vmax.f32 %v2087_v9, %v1941_v18  ;;  %v2096_v50 = vld [vmem:[%s3579_s22] sm:$0xf] }
 0x2d6   : > { %v1750_v56 = vpop.f32.mrf.mxu1  ;;  %v1943_v15 = vpop.f32.mrf.mxu0 }
 0x2d7   : > { %v1978_v17 = vmax.f32 %v1977_v60, %v1750_v56  ;;  %v2052_v54 = vmax.f32 %v2051_v52, %v1943_v15 }
 0x2d8   : > { %v1752_v57 = vpop.f32.mrf.mxu1  ;;  %v1945_v23 = vpop.f32.mrf.mxu0 }
 0x2d9   : > { %v1979_v62 = vrot.slane %v1978_v17, 4  ;;  %v2053_v63 = vrot.slane %v2052_v54, 4  ;;  %v2015_v27 = vmax.f32 %v2014_v16, %v1752_v57  ;;  %v2089_v25 = vmax.f32 %v2088_v53, %v1945_v23 }
 0x2db   : > { %v1980_v4 = vmax.f32 %v1978_v17, %v1979_v62  ;;  %v2054_v5 = vmax.f32 %v2052_v54, %v2053_v63  ;;  %v2016_v29 = vrot.slane %v2015_v27, 4  ;;  %v2090_v35 = vrot.slane %v2089_v25, 4 }
 0x2dd   : > { %v1981_v14 = vrot.slane %v1980_v4, 2  ;;  %v2055_v28 = vrot.slane %v2054_v5, 2  ;;  %v2017_v20 = vmax.f32 %v2015_v27, %v2016_v29  ;;  %v2091_v19 = vmax.f32 %v2089_v25, %v2090_v35 }
 0x2df   : > { %v1982_v24 = vmax.f32 %v1980_v4, %v1981_v14  ;;  %v2056_v39 = vmax.f32 %v2054_v5, %v2055_v28  ;;  %v2018_v10 = vrot.slane %v2017_v20, 2  ;;  %v2092_v40 = vrot.slane %v2091_v19, 2 }
 0x2e1   : > { %v1983_v1 = vrot.slane %v1982_v24, 1  ;;  %v2057_v41 = vrot.slane %v2056_v39, 1  ;;  %v2019_v37 = vmax.f32 %v2017_v20, %v2018_v10  ;;  %v2093_v42 = vmax.f32 %v2091_v19, %v2092_v40 }
 0x2e3   : > { %v1984_v12 = vmax.f32 %v1982_v24, %v1983_v1  ;;  %v2058_v46 = vmax.f32 %v2056_v39, %v2057_v41  ;;  %v2020_v47 = vrot.slane %v2019_v37, 1  ;;  %v2094_v11 = vrot.slane %v2093_v42, 1 }
 0x2e5   : > { %v2119_v21 = vadd.f32 %v2102_v31, %v1984_v12  ;;  %v2121_v22 = vadd.f32 %v2110_v2, %v2058_v46  ;;  %v2021_v30 = vmax.f32 %v2019_v37, %v2020_v47  ;;  %v2095_v6 = vmax.f32 %v2093_v42, %v2094_v11 }
 0x2e7   : > { %v2120_v34 = vadd.f32 %v2106_v13, %v2021_v30  ;;  %v2122_v43 = vadd.f32 %v2114_v0, %v2095_v6 }
 0x2e9   : > { %v2127_v44 = vcombine.low %v2119_v21, %v2120_v34  ;;  %v2128_v48 = vcombine.low %v2121_v22, %v2122_v43 }
 0x2eb   : > { %v2135_v7 = vrot.slane %v2127_v44, %v2134_v36  ;;  %v2142_v49 = vrot.slane %v2128_v48, %v2134_v36 }
 0x2ed   : > { %v2143_v8 = vcombine.low %v2135_v7, %v2142_v49 }
 0x2ef   : > { %v2150_v18 = vrot.slane %v2143_v8, %v2134_v36 }
 0x2f1   : > { %v2152_v51 = vmax.f32 %v2096_v50, %v2150_v18 }
 0x2f3   : > { %2157 = vst.msk [vmem:[%s3579_s22] sm:$0xf] %vm3571_vm1, %v2152_v51 }
 0x2f4   : > { %2898 = shalt.err (!%p2895_p7)
}
 0x2f5   : > { %s2899_s16 = scalar_lea.hbm %s2173_s9, 64  ;;  %s2903_s21 = scalar_lea.hbm %s3865_s7, 256 }
 0x2f6   : > { %p2900_p9 = scmp.ne.s32.totalorder %s2173_s9, %s2899_s16  ;;  %p2904_p12 = scmp.lt.s32.totalorder %s2173_s9, %s3865_s7 }
 0x2f7   : > { %p2905_p13 = scmp.lt.s32.totalorder %s2903_s21, %s2899_s16 }
 0x2f8   : > { %p2901_p10 = pnand %p2900_p9, %p3076_p3 }
 0x2f9   : > { %p2906_p0 = por %p2905_p13, %p2904_p12 }
 0x2fa   : > { %p2902_p11 = pneg %p2901_p10 }
 0x2fc   : > { %p2907_p1 = pnand %p2906_p0, %p2902_p11 }
 0x2fe   : > { %2910 = shalt.err (!%p2907_p1)
}
 0x2ff   : > { %2476 = dma.vmem_to_hbm [thread:$0]  (%p3076_p3), %s2176_s18, 64, %s2173_s9, %s2159_s27  }
 0x300 PF: > { %p2482_p2 = scmp.ge.s32.totalorder %s2977_s8, 2  ;;  %s2187_s28 = sand.u32 1, %s2949_s24  }
 0x301   : > { %s2188_s10 = scalar_lea.sflag [#allocation3], %s2187_s28 }
 0x302   : > { %p2479_p4 = pnand %p2482_p2, %p3085_p8 }
 0x304   : > { %p2480_p5 = pneg %p2479_p4 }
 0x306   : > { %2944 = dma.done.wait (%p2480_p5), %s2188_s10, 64  }
 0x307   : > { %2946 = vsyncadd (%p2480_p5), %s2188_s10, 4294967232  ;;  %s20_s8 = sadd.s32 1, %s2977_s8   ;;  %s3917_s24 = smov %s2953_s25 }
 0x308   : > { %p17_p6 = scmp.ge.s32.totalorder %s20_s8, 6   ;;  %s3918_s25 = smov %s2957_s26 }
 0x309   : > { %s3919_s26 = smov %s3094_s19  ;;  %s3920_s27 = smov %s2969_s29 }
 0x30a   : > { %s3921_s28 = smov %s2973_s30  ;;  %s3922_s29 = smov %s3925_s11 }
 0x30b   : > { %s3923_s30 = smov %s3929_s12  ;;  %19 = sbr.rel (!%p17_p6) target bundleno = 7 (0x7), region = 87 }
 0x310   :  { %2193 = vsyncpa [#allocation3], 1 }
 0x311   :  { %2195 = vsyncpa [#allocation3 + $0x1], 1 }

</bundles_post_ra>
